<compile_context>
chip_gen: v7x
topology: tpu7x:2x2x1
jax: 0.10.0
libtpu: 0.0.40
codegen_flags: <defaults>
</compile_context>

<pallas_src>
import functools

import jax
import jax.numpy as jnp
from jax.experimental import pallas as pl
from jax.experimental.pallas import tpu as pltpu

# ---- architecture constants implied by the module ---------------------------
C_IN_H = 22                      # EEG electrode rows (conv2 kernel height)
T_IN   = 558                     # time samples so that final width == 74
K1     = 13                      # conv1 temporal kernel
F1     = 40                      # conv1 / conv2 output channels
W_CONV = T_IN - K1 + 1           # 546
POOL_K = 35
POOL_S = 7
W_POOL = (W_CONV - POOL_K) // POOL_S + 1   # 74  -> classifier in = 40*74 = 2960
N_CLS  = 4
BN_EPS = 1e-5

H_PAD  = 32                      # electrode axis 22 -> 32 (bf16 sublane-tile aligned)
K_EFF  = K1 * H_PAD              # 416 composed contraction size (rows = k*32 + h)
NB_MAX = 32                      # batch elements fused per grid step


# ---- Pallas kernel -----------------------------------------------------------
def shallownet_kernel(x_ref, w_ref, b_ref, pool_ref, feat_ref,
                      patch_ref, y2_ref, *, nb):
    """One grid step: nb batch elements -> log-pooled features (nb, 40, 74).

    x_ref:     (nb, 32, 558)  bf16   input block (h padded with zeros)
    w_ref:     (40, 416)      bf16   conv1 . conv2 . BN-scale folded weight
    b_ref:     (40, 1)        f32    folded BN shift
    pool_ref:  (546, 74)      bf16   exact 0/1 pooling selector
    feat_ref:  (nb, 40, 74)   f32    output block (log of pooled activations)
    patch_ref: (416, 546)     bf16   scratch, reused per element (im2col)
    y2_ref:    (nb*40, 546)   f32    scratch, squared BN output for the block
    """
    w = w_ref[...]                                   # (40, 416)
    bias = b_ref[...]                                # (40, 1)

    def body(m, carry):
        xm = x_ref[m]                                # (32, 558) bf16
        # im2col into the reused scratch: rows [32k, 32k+32) <- x[:, k:k+546]
        # (13 sublane-tile-aligned stores of lane-shifted blocks; no concat temp)
        for k in range(K1):                          # static, 13 taps
            patch_ref[32 * k:32 * (k + 1), :] = xm[:, k:k + W_CONV]

        # fused conv1 . conv2 . BN-scale on the MXU (bf16 operands, f32 accum)
        y = jnp.dot(w, patch_ref[...],
                    preferred_element_type=jnp.float32)          # (40, 546)
        y = y + bias                                 # folded BN shift
        y = y * y                                    # square nonlinearity

        row = pl.multiple_of(m * F1, 8)              # f32 sublane-aligned store
        y2_ref[pl.ds(row, F1), :] = y
        return carry

    jax.lax.fori_loop(0, nb, body, 0)

    # AvgPool2d((1,35), stride (1,7)) as ONE long-M bf16 matmul for the whole
    # block: (nb*40, 546) @ (546, 74), f32 accumulation, 1/35 applied in f32.
    acts = y2_ref[...].astype(jnp.bfloat16)
    pooled = jnp.dot(acts, pool_ref[...],
                     preferred_element_type=jnp.float32)          # (nb*40, 74)
    feat_ref[...] = jnp.log(pooled * (1.0 / POOL_K)).reshape(nb, F1, W_POOL)


# ---- wrapper -----------------------------------------------------------------
@jax.jit
def shallow_convnet_forward(x, params):
    """x: (B, 1, 22, 558) float32 (NCHW).  Returns logits (B, 4)."""
    B = x.shape[0]

    # Batch block: amortize per-step overhead, keep >= 2 grid steps when B >= 2
    # (so dimension_semantics=('parallel',) can use both v7x TensorCores).
    nb = NB_MAX if B > NB_MAX else max(1, (B + 1) // 2)
    b_pad = ((B + nb - 1) // nb) * nb
    grid = (b_pad // nb,)

    # Squeeze the singleton channel, cast to bf16 host-side (halves HBM/DMA and
    # in-kernel im2col traffic), pad batch and the electrode axis 22 -> 32.
    x3 = x.reshape(B, C_IN_H, T_IN).astype(jnp.bfloat16)
    x3 = jnp.pad(x3, ((0, b_pad - B), (0, H_PAD - C_IN_H), (0, 0)))

    # conv1 . conv2 . BatchNorm(scale) folded into one weight; BN shift -> bias.
    w1 = params["conv1_w"].reshape(F1, K1)                            # (ci, k)
    w2 = params["conv2_w"][..., 0]                                    # (co, ci, h)
    scale = params["bn_gamma"] * jax.lax.rsqrt(params["bn_var"] + BN_EPS)
    wkh = jnp.einsum("cih,ik->ckh", w2, w1) * scale[:, None, None]    # (40, 13, 22)
    wkh = jnp.pad(wkh, ((0, 0), (0, 0), (0, H_PAD - C_IN_H)))         # (40, 13, 32)
    weff = wkh.reshape(F1, K_EFF).astype(jnp.bfloat16)                # rows = k*32 + h
    bias = (params["bn_beta"] - params["bn_mean"] * scale).reshape(F1, 1)
    bias = bias.astype(jnp.float32)

    # Average pooling as an exact 0/1 bf16 selector (1/35 applied in-kernel f32).
    w_idx = jnp.arange(W_CONV)[:, None]
    j_idx = jnp.arange(W_POOL)[None, :]
    pool01 = ((w_idx >= POOL_S * j_idx)
              & (w_idx < POOL_S * j_idx + POOL_K)).astype(jnp.bfloat16)

    feats = pl.pallas_call(
        functools.partial(shallownet_kernel, nb=nb),
        out_shape=jax.ShapeDtypeStruct((b_pad, F1, W_POOL), jnp.float32),
        grid=grid,
        in_specs=[
            pl.BlockSpec((nb, H_PAD, T_IN), lambda i: (i, 0, 0)),     # nb batch elements
            pl.BlockSpec((F1, K_EFF), lambda i: (0, 0)),              # composed conv weight
            pl.BlockSpec((F1, 1), lambda i: (0, 0)),                  # folded BN bias
            pl.BlockSpec((W_CONV, W_POOL), lambda i: (0, 0)),         # 0/1 pooling selector
        ],
        out_specs=pl.BlockSpec((nb, F1, W_POOL), lambda i: (i, 0, 0)),
        scratch_shapes=[
            pltpu.VMEM((K_EFF, W_CONV), jnp.bfloat16),                # im2col patches
            pltpu.VMEM((nb * F1, W_CONV), jnp.float32),               # squared BN output
        ],
        compiler_params=pltpu.CompilerParams(
            dimension_semantics=("parallel",),
            vmem_limit_bytes=32 * 1024 * 1024),
    )(x3, weff, bias, pool01)

    # Dropout(0.25) is identity in eval mode.  The tiny (B,2960)@(2960,4)
    # classifier runs in XLA (avoids the in-kernel (40,74)->2960 relayout and the
    # N=4 MXU underfill); padded batch rows are sliced off before it.
    feats = feats[:B].reshape(B, F1 * W_POOL)                         # channel-major flatten
    return feats @ params["fc_w"].T + params["fc_b"]


# ---- pure-JAX reference (for a sanity check) ---------------------------------
def reference_forward(x, params):
    B = x.shape[0]
    xs = x[:, 0].astype(jnp.float32)                               # (B, 22, 558)
    w1 = params["conv1_w"].reshape(F1, K1)
    cols = jnp.stack([xs[:, :, k:k + W_CONV] for k in range(K1)], axis=-1)  # (B,22,546,13)
    y1 = jnp.einsum("bhwk,ck->bchw", cols, w1)                     # (B,40,22,546)
    w2 = params["conv2_w"][..., 0]                                 # (40,40,22)
    y2 = jnp.einsum("bihw,oih->bow", y1, w2)                       # (B,40,546)
    inv = 1.0 / jnp.sqrt(params["bn_var"] + BN_EPS)
    y2 = ((y2 - params["bn_mean"][None, :, None]) * inv[None, :, None]
          * params["bn_gamma"][None, :, None] + params["bn_beta"][None, :, None])
    y2 = y2 ** 2
    pooled = jnp.stack(
        [y2[:, :, POOL_S * j:POOL_S * j + POOL_K].mean(-1) for j in range(W_POOL)],
        axis=-1)                                                   # (B,40,74)
    feat = jnp.log(pooled).reshape(B, F1 * W_POOL)
    return feat @ params["fc_w"].T + params["fc_b"]


# ---- main --------------------------------------------------------------------
if __name__ == "__main__":
    key = jax.random.PRNGKey(0)
    ks = jax.random.split(key, 9)

    # Deterministic synthetic parameters (shapes from the module __init__).
    params = {
        "conv1_w": 0.10 * jax.random.normal(ks[0], (F1, 1, 1, K1), jnp.float32),
        "conv2_w": 0.05 * jax.random.normal(ks[1], (F1, F1, C_IN_H, 1), jnp.float32),
        "bn_gamma": 1.0 + 0.1 * jax.random.normal(ks[2], (F1,), jnp.float32),
        "bn_beta": 0.1 * jax.random.normal(ks[3], (F1,), jnp.float32),
        "bn_mean": 0.1 * jax.random.normal(ks[4], (F1,), jnp.float32),
        "bn_var": 1.0 + 0.1 * jax.random.uniform(ks[5], (F1,), jnp.float32),
        "fc_w": 0.02 * jax.random.normal(ks[6], (N_CLS, F1 * W_POOL), jnp.float32),
        "fc_b": 0.02 * jax.random.normal(ks[7], (N_CLS,), jnp.float32),
    }

    B = 2
    x = jax.random.normal(ks[8], (B, 1, C_IN_H, T_IN), jnp.float32)

    logits = shallow_convnet_forward(x, params)
    logits = jax.block_until_ready(logits)
    assert logits.shape == (B, N_CLS)

    ref = jax.block_until_ready(reference_forward(x, params))
    assert jnp.allclose(logits, ref, rtol=5e-2, atol=5e-2), (
        f"mismatch: max abs diff {jnp.max(jnp.abs(logits - ref))}")

    print("KERNEL_OK")
</pallas_src>

<mosaic_0001>
module attributes {stable_mosaic.version = 11 : i64} {
  func.func @shallownet_kernel(%arg0: i32, %arg1: memref<1x32x558xbf16, #tpu.memory_space<vmem>>, %arg2: memref<40x416xbf16, #tpu.memory_space<vmem>>, %arg3: memref<40x1xf32, #tpu.memory_space<vmem>>, %arg4: memref<546x74xbf16, #tpu.memory_space<vmem>>, %arg5: memref<1x40x74xf32, #tpu.memory_space<vmem>>, %arg6: memref<416x546xbf16, #tpu.memory_space<vmem>>, %arg7: memref<40x546xf32, #tpu.memory_space<vmem>>) attributes {dimension_semantics = [#tpu.dimension_semantics<parallel>], iteration_bounds = array<i64: 2>, scalar_prefetch = 0 : i64, scratch_operands = 2 : i64, tpu.core_type = #tpu.core_type<tc>, window_params = [{transform_indices = @transform_0, window_bounds = array<i64: 1, 32, 558>}, {pipeline_mode = #tpu.pipeline_mode<synchronous>, transform_indices = @transform_1, window_bounds = array<i64: 40, 416>}, {pipeline_mode = #tpu.pipeline_mode<synchronous>, transform_indices = @transform_2, window_bounds = array<i64: 40, 1>}, {pipeline_mode = #tpu.pipeline_mode<synchronous>, transform_indices = @transform_3, window_bounds = array<i64: 546, 74>}, {transform_indices = @transform_4, window_bounds = array<i64: 1, 40, 74>}]} {
    %c0 = arith.constant 0 : index
    %c0_0 = arith.constant 0 : index
    %0 = vector.load %arg2[%c0, %c0_0] : memref<40x416xbf16, #tpu.memory_space<vmem>>, vector<40x416xbf16>
    %c0_1 = arith.constant 0 : index
    %c0_2 = arith.constant 0 : index
    %1 = vector.load %arg3[%c0_1, %c0_2] : memref<40x1xf32, #tpu.memory_space<vmem>>, vector<40x1xf32>
    %c0_i32 = arith.constant 0 : i32
    %2 = arith.index_cast %c0_i32 : i32 to index
    %c0_3 = arith.constant 0 : index
    %c0_4 = arith.constant 0 : index
    %3 = vector.load %arg1[%2, %c0_3, %c0_4] : memref<1x32x558xbf16, #tpu.memory_space<vmem>>, vector<1x32x558xbf16>
    %4 = vector.shape_cast %3 : vector<1x32x558xbf16> to vector<32x558xbf16>
    %5 = vector.extract_strided_slice %4 {offsets = [0, 0], sizes = [32, 546], strides = [1, 1]} : vector<32x558xbf16> to vector<32x546xbf16>
    %c0_5 = arith.constant 0 : index
    %c0_6 = arith.constant 0 : index
    %6 = vector.load %arg6[%c0_5, %c0_6] : memref<416x546xbf16, #tpu.memory_space<vmem>>, vector<32x546xbf16>
    tpu.vector_store %arg6[%c0_5, %c0_6], %5 {strides = array<i32>} : memref<416x546xbf16, #tpu.memory_space<vmem>>, vector<32x546xbf16>,
    %7 = vector.extract_strided_slice %4 {offsets = [0, 1], sizes = [32, 546], strides = [1, 1]} : vector<32x558xbf16> to vector<32x546xbf16>
    %c32 = arith.constant 32 : index
    %c0_7 = arith.constant 0 : index
    %8 = vector.load %arg6[%c32, %c0_7] : memref<416x546xbf16, #tpu.memory_space<vmem>>, vector<32x546xbf16>
    tpu.vector_store %arg6[%c32, %c0_7], %7 {strides = array<i32>} : memref<416x546xbf16, #tpu.memory_space<vmem>>, vector<32x546xbf16>,
    %9 = vector.extract_strided_slice %4 {offsets = [0, 2], sizes = [32, 546], strides = [1, 1]} : vector<32x558xbf16> to vector<32x546xbf16>
    %c64 = arith.constant 64 : index
    %c0_8 = arith.constant 0 : index
    %10 = vector.load %arg6[%c64, %c0_8] : memref<416x546xbf16, #tpu.memory_space<vmem>>, vector<32x546xbf16>
    tpu.vector_store %arg6[%c64, %c0_8], %9 {strides = array<i32>} : memref<416x546xbf16, #tpu.memory_space<vmem>>, vector<32x546xbf16>,
    %11 = vector.extract_strided_slice %4 {offsets = [0, 3], sizes = [32, 546], strides = [1, 1]} : vector<32x558xbf16> to vector<32x546xbf16>
    %c96 = arith.constant 96 : index
    %c0_9 = arith.constant 0 : index
    %12 = vector.load %arg6[%c96, %c0_9] : memref<416x546xbf16, #tpu.memory_space<vmem>>, vector<32x546xbf16>
    tpu.vector_store %arg6[%c96, %c0_9], %11 {strides = array<i32>} : memref<416x546xbf16, #tpu.memory_space<vmem>>, vector<32x546xbf16>,
    %13 = vector.extract_strided_slice %4 {offsets = [0, 4], sizes = [32, 546], strides = [1, 1]} : vector<32x558xbf16> to vector<32x546xbf16>
    %c128 = arith.constant 128 : index
    %c0_10 = arith.constant 0 : index
    %14 = vector.load %arg6[%c128, %c0_10] : memref<416x546xbf16, #tpu.memory_space<vmem>>, vector<32x546xbf16>
    tpu.vector_store %arg6[%c128, %c0_10], %13 {strides = array<i32>} : memref<416x546xbf16, #tpu.memory_space<vmem>>, vector<32x546xbf16>,
    %15 = vector.extract_strided_slice %4 {offsets = [0, 5], sizes = [32, 546], strides = [1, 1]} : vector<32x558xbf16> to vector<32x546xbf16>
    %c160 = arith.constant 160 : index
    %c0_11 = arith.constant 0 : index
    %16 = vector.load %arg6[%c160, %c0_11] : memref<416x546xbf16, #tpu.memory_space<vmem>>, vector<32x546xbf16>
    tpu.vector_store %arg6[%c160, %c0_11], %15 {strides = array<i32>} : memref<416x546xbf16, #tpu.memory_space<vmem>>, vector<32x546xbf16>,
    %17 = vector.extract_strided_slice %4 {offsets = [0, 6], sizes = [32, 546], strides = [1, 1]} : vector<32x558xbf16> to vector<32x546xbf16>
    %c192 = arith.constant 192 : index
    %c0_12 = arith.constant 0 : index
    %18 = vector.load %arg6[%c192, %c0_12] : memref<416x546xbf16, #tpu.memory_space<vmem>>, vector<32x546xbf16>
    tpu.vector_store %arg6[%c192, %c0_12], %17 {strides = array<i32>} : memref<416x546xbf16, #tpu.memory_space<vmem>>, vector<32x546xbf16>,
    %19 = vector.extract_strided_slice %4 {offsets = [0, 7], sizes = [32, 546], strides = [1, 1]} : vector<32x558xbf16> to vector<32x546xbf16>
    %c224 = arith.constant 224 : index
    %c0_13 = arith.constant 0 : index
    %20 = vector.load %arg6[%c224, %c0_13] : memref<416x546xbf16, #tpu.memory_space<vmem>>, vector<32x546xbf16>
    tpu.vector_store %arg6[%c224, %c0_13], %19 {strides = array<i32>} : memref<416x546xbf16, #tpu.memory_space<vmem>>, vector<32x546xbf16>,
    %21 = vector.extract_strided_slice %4 {offsets = [0, 8], sizes = [32, 546], strides = [1, 1]} : vector<32x558xbf16> to vector<32x546xbf16>
    %c256 = arith.constant 256 : index
    %c0_14 = arith.constant 0 : index
    %22 = vector.load %arg6[%c256, %c0_14] : memref<416x546xbf16, #tpu.memory_space<vmem>>, vector<32x546xbf16>
    tpu.vector_store %arg6[%c256, %c0_14], %21 {strides = array<i32>} : memref<416x546xbf16, #tpu.memory_space<vmem>>, vector<32x546xbf16>,
    %23 = vector.extract_strided_slice %4 {offsets = [0, 9], sizes = [32, 546], strides = [1, 1]} : vector<32x558xbf16> to vector<32x546xbf16>
    %c288 = arith.constant 288 : index
    %c0_15 = arith.constant 0 : index
    %24 = vector.load %arg6[%c288, %c0_15] : memref<416x546xbf16, #tpu.memory_space<vmem>>, vector<32x546xbf16>
    tpu.vector_store %arg6[%c288, %c0_15], %23 {strides = array<i32>} : memref<416x546xbf16, #tpu.memory_space<vmem>>, vector<32x546xbf16>,
    %25 = vector.extract_strided_slice %4 {offsets = [0, 10], sizes = [32, 546], strides = [1, 1]} : vector<32x558xbf16> to vector<32x546xbf16>
    %c320 = arith.constant 320 : index
    %c0_16 = arith.constant 0 : index
    %26 = vector.load %arg6[%c320, %c0_16] : memref<416x546xbf16, #tpu.memory_space<vmem>>, vector<32x546xbf16>
    tpu.vector_store %arg6[%c320, %c0_16], %25 {strides = array<i32>} : memref<416x546xbf16, #tpu.memory_space<vmem>>, vector<32x546xbf16>,
    %27 = vector.extract_strided_slice %4 {offsets = [0, 11], sizes = [32, 546], strides = [1, 1]} : vector<32x558xbf16> to vector<32x546xbf16>
    %c352 = arith.constant 352 : index
    %c0_17 = arith.constant 0 : index
    %28 = vector.load %arg6[%c352, %c0_17] : memref<416x546xbf16, #tpu.memory_space<vmem>>, vector<32x546xbf16>
    tpu.vector_store %arg6[%c352, %c0_17], %27 {strides = array<i32>} : memref<416x546xbf16, #tpu.memory_space<vmem>>, vector<32x546xbf16>,
    %29 = vector.extract_strided_slice %4 {offsets = [0, 12], sizes = [32, 546], strides = [1, 1]} : vector<32x558xbf16> to vector<32x546xbf16>
    %c384 = arith.constant 384 : index
    %c0_18 = arith.constant 0 : index
    %30 = vector.load %arg6[%c384, %c0_18] : memref<416x546xbf16, #tpu.memory_space<vmem>>, vector<32x546xbf16>
    tpu.vector_store %arg6[%c384, %c0_18], %29 {strides = array<i32>} : memref<416x546xbf16, #tpu.memory_space<vmem>>, vector<32x546xbf16>,
    %c0_19 = arith.constant 0 : index
    %c0_20 = arith.constant 0 : index
    %31 = vector.load %arg6[%c0_19, %c0_20] : memref<416x546xbf16, #tpu.memory_space<vmem>>, vector<416x546xbf16>
    %cst = arith.constant dense<0.000000e+00> : vector<40x546xf32>
    %32 = tpu.matmul %0, %31, %cst {dimension_numbers = #tpu.dot_dimension_numbers<[1], [0], [0], [1], [0, 0, 1, 1], [], []>} : vector<40x416xbf16>, vector<416x546xbf16>, vector<40x546xf32> -> vector<40x546xf32>
    %33 = vector.broadcast %1 : vector<40x1xf32> to vector<40x546xf32>
    %34 = arith.addf %32, %33 : vector<40x546xf32>
    %35 = arith.mulf %34, %34 : vector<40x546xf32>
    %c40_i32 = arith.constant 40 : i32
    %36 = arith.muli %c0_i32, %c40_i32 : i32
    %37 = tpu.assume_multiple %36, 8 : i32
    %38 = arith.index_cast %37 : i32 to index
    %c0_21 = arith.constant 0 : index
    %39 = vector.load %arg7[%38, %c0_21] : memref<40x546xf32, #tpu.memory_space<vmem>>, vector<40x546xf32>
    tpu.vector_store %arg7[%38, %c0_21], %35 {strides = array<i32>} : memref<40x546xf32, #tpu.memory_space<vmem>>, vector<40x546xf32>,
    %c1_i32 = arith.constant 1 : i32
    %c0_22 = arith.constant 0 : index
    %c0_23 = arith.constant 0 : index
    %40 = vector.load %arg7[%c0_22, %c0_23] : memref<40x546xf32, #tpu.memory_space<vmem>>, vector<40x546xf32>
    %41 = arith.truncf %40 : vector<40x546xf32> to vector<40x546xbf16>
    %c0_24 = arith.constant 0 : index
    %c0_25 = arith.constant 0 : index
    %42 = vector.load %arg4[%c0_24, %c0_25] : memref<546x74xbf16, #tpu.memory_space<vmem>>, vector<546x74xbf16>
    %cst_26 = arith.constant dense<0.000000e+00> : vector<40x74xf32>
    %43 = tpu.matmul %41, %42, %cst_26 {dimension_numbers = #tpu.dot_dimension_numbers<[1], [0], [0], [1], [0, 0, 1, 1], [], []>} : vector<40x546xbf16>, vector<546x74xbf16>, vector<40x74xf32> -> vector<40x74xf32>
    %cst_27 = arith.constant 0.0285714287 : f32
    %44 = vector.broadcast %cst_27 : f32 to vector<40x74xf32>
    %45 = arith.mulf %43, %44 : vector<40x74xf32>
    %46 = math.log %45 : vector<40x74xf32>
    %47 = vector.shape_cast %46 : vector<40x74xf32> to vector<1x40x74xf32>
    %c0_28 = arith.constant 0 : index
    %c0_29 = arith.constant 0 : index
    %c0_30 = arith.constant 0 : index
    %48 = vector.load %arg5[%c0_28, %c0_29, %c0_30] : memref<1x40x74xf32, #tpu.memory_space<vmem>>, vector<1x40x74xf32>
    tpu.vector_store %arg5[%c0_28, %c0_29, %c0_30], %47 {strides = array<i32>} : memref<1x40x74xf32, #tpu.memory_space<vmem>>, vector<1x40x74xf32>,
    return
  }
  func.func @transform_0(%arg0: i32) -> (i32, i32, i32) {
    %c0_i32 = arith.constant 0 : i32
    %c0_i32_0 = arith.constant 0 : i32
    %c0_i32_1 = arith.constant 0 : i32
    return %arg0, %c0_i32, %c0_i32_0 : i32, i32, i32
  }
  func.func @transform_1(%arg0: i32) -> (i32, i32) {
    %c0_i32 = arith.constant 0 : i32
    %c0_i32_0 = arith.constant 0 : i32
    %c0_i32_1 = arith.constant 0 : i32
    return %c0_i32, %c0_i32_0 : i32, i32
  }
  func.func @transform_2(%arg0: i32) -> (i32, i32) {
    %c0_i32 = arith.constant 0 : i32
    %c0_i32_0 = arith.constant 0 : i32
    %c0_i32_1 = arith.constant 0 : i32
    return %c0_i32, %c0_i32_0 : i32, i32
  }
  func.func @transform_3(%arg0: i32) -> (i32, i32) {
    %c0_i32 = arith.constant 0 : i32
    %c0_i32_0 = arith.constant 0 : i32
    %c0_i32_1 = arith.constant 0 : i32
    return %c0_i32, %c0_i32_0 : i32, i32
  }
  func.func @transform_4(%arg0: i32) -> (i32, i32, i32) {
    %c0_i32 = arith.constant 0 : i32
    %c0_i32_0 = arith.constant 0 : i32
    %c0_i32_1 = arith.constant 0 : i32
    return %arg0, %c0_i32, %c0_i32_0 : i32, i32, i32
  }
}

</mosaic_0001>

<bundles_post_ra>
// kernel: shallow_convnet_forward.1
= control target key start
LH: loop header
LB: loop body
LE: loop exit
PB: predicated region body
PF: predicated region fallthrough
CT: control target
= control target key end

     0   :  { %s2480_s15 = smov 0   ;;  %s3122_s0 = inlined_call_operand.vmem [shape: bf16[2,32,558], index: 0, kind: input, shape index: {}]   ;;  %s3123_s1 = inlined_call_operand.vmem [shape: bf16[40,416], index: 1, kind: input, shape index: {}]   ;;  %s3124_s2 = inlined_call_operand.vmem [shape: f32[40,1], index: 2, kind: input, shape index: {}]   ;;  %s3125_s3 = inlined_call_operand.vmem [shape: bf16[546,74], index: 3, kind: input, shape index: {}]   ;;  %s3126_s4 = inlined_call_operand.vmem [shape: f32[2,40,74], index: 4, kind: output, shape index: {}]  }
   0x1 LB: > { %s2075_s16 = sadd.s32 4294967295, %s2438_s15   ;;  %p2079_p0 = scmp.ge.s32.totalorder %s2438_s15, 1  ;;  %s2438_s15 = sphi %s2480_s15, %s14_s15  }
   0x2   : > { %p162_p1 = scmp.lt.s32.totalorder %s2438_s15, 3 }
   0x4   : > { %p163_p2 = pnand %p2079_p0, %p162_p1 }
   0x5   : > { %p188_p3 = scmp.lt.s32.totalorder (!%p163_p2), %s2075_s16, 1  ;;  %s2440_s21 = smov (!%p163_p2), 127   ;;  %vm282_vm0 = vcmask (!%p163_p2), 277504   ;;  %vm309_vm1 = vcmask (!%p163_p2), 1039360   ;;  %v2370_v25 = vld [vmem:[%s3123_s1 + $0x4] ss:$16 sps:$4 sm:$0xff] (!%p163_p2)  }
   0x6   : > { %166 = sbr.rel (%p163_p2) target bundleno = 883 (0x373), region = 36  ;;  %s2441_s22 = smov (!%p163_p2), 126   ;;  %vm358_vm2 = vcmask (!%p163_p2), 1031168   ;;  %1247 = vmatprep.mubr.bf16.mxu1 (!%p163_p2), %v2370_v25  ;;  %1125 = vmatprep.mubr.bf16.mxu0 (!%p163_p2), %v2370_v25  ;;  %vm407_vm3 = vcmask (!%p163_p2), 1022976   ;;  %vm456_vm4 = vcmask (!%p163_p2), 1014784   ;;  %vm505_vm5 = vcmask (!%p163_p2), 1006592  }
   0x7   : > { %s2442_s23 = smov (!%p163_p2), 125   ;;  %s2443_s24 = smov (!%p163_p2), 124   ;;  %vm554_vm6 = vcmask (!%p163_p2), 998400   ;;  %vm603_vm7 = vcmask (!%p163_p2), 990208   ;;  %vm652_vm8 = vcmask (!%p163_p2), 982016   ;;  %vm1083_vm9 = vcmask (!%p163_p2), 261120  }
   0x8   : > { %s2444_s25 = smov (!%p163_p2), 123   ;;  %s2445_s26 = smov (!%p163_p2), 122   ;;  %vm701_vm10 = vcmask (!%p163_p2), 973824   ;;  %vm750_vm11 = vcmask (!%p163_p2), 965632   ;;  %vm799_vm12 = vcmask (!%p163_p2), 957440   ;;  %vm848_vm13 = vcmask (!%p163_p2), 949248  }
   0x9   : > { %s2446_s27 = smov (!%p163_p2), 121   ;;  %s2447_s30 = smov (!%p163_p2), 120   ;;  %vm1827_vm14 = vcmask (!%p163_p2), 1040384   ;;  %vm2454_vm15 = vmmov (!%p163_p2), 0  }
   0xa   : > { %s2448_s5 = smov (!%p163_p2), 119   ;;  %s2449_s6 = smov (!%p163_p2), 118  }
   0xb   : > { %s2450_s7 = smov (!%p163_p2), 117   ;;  %s2451_s8 = smov (!%p163_p2), 116  }
   0xd   : > { %s3128_s16 = smov (!%p188_p3, %s2075_s16), 1 }
   0xe   : > { %s2329_s17 = smul.u32 80, %s3128_s16 }
   0xf   : > { %s2330_s13 = smul.u32 40, %s3128_s16 }
  0x10   : > { %s192_s20 = scalar_lea.vmem %s3122_s0, %s2329_s17 }
  0x11   : > { %v2494_v0 = vld [vmem:[%s192_s20 + $0xc] ss:$20 sps:$4 sm:$0xff]   ;;  %v2496_v1 = vld [vmem:[%s192_s20 + $0x8] ss:$20 sps:$4 sm:$0xff]   ;;  %v2499_v2 = vld [vmem:[%s192_s20 + $0x10] ss:$20 sps:$4 sm:$0xff]   ;;  %s197_s18 = scalar_lea.vmem %s3126_s4, %s2330_s13 }
  0x12   : > { %295 = vrot.lane.b32.xlu0 %v2494_v0, %s2440_s21  ;;  %1215 = vmatprep.subr.bf16.mxu1 %v2494_v0  ;;  %v2503_v3 = vld [vmem:[%s192_s20 + $0x4] ss:$20 sps:$4 sm:$0xff]   ;;  %v2506_v4 = vld [vmem:[%s192_s20 + $0x34] ss:$20 sps:$4 sm:$0xff]   ;;  %283 = vst.msk [vmem:[#allocation2 + $0x20] sm:$0xff] %vm282_vm0, %v2499_v2 }
  0x13   : > { %293 = vrot.lane.b32.xlu1 %v2496_v1, %s2440_s21  ;;  %1216 = vmatpush1.bf16.msra.mxu1 %v2496_v1  ;;  %v2508_v5 = vld [vmem:[%s192_s20] ss:$20 sps:$4 sm:$0xff]   ;;  %v2510_v6 = vld [vmem:[%s192_s20 + $0x30] ss:$20 sps:$4 sm:$0xff]   ;;  %v2514_v7 = vld [vmem:[%s192_s20 + $0x38] ss:$20 sps:$4 sm:$0xff]  }
  0x14   : > { %1093 = vmatprep.subr.bf16.mxu0 %v2503_v3  ;;  %v2518_v8 = vld [vmem:[%s192_s20 + $0x28] ss:$20 sps:$4 sm:$0xff]   ;;  %v2522_v9 = vld [vmem:[%s192_s20 + $0x2c] ss:$20 sps:$4 sm:$0xff]   ;;  %288 = vst.msk [vmem:[#allocation2 + $0x48] sm:$0xff] %vm282_vm0, %v2514_v7  ;;  %1217 = vmatprep.subr.bf16.mxu1 %v2506_v4 }
  0x15   : > { %1094 = vmatpush1.bf16.msra.mxu0 %v2508_v5 }
  0x16   : > { %297 = vrot.lane.b32.xlu0 %v2499_v2, %s2440_s21  ;;  %1095 = vmatprep.subr.bf16.mxu0 %v2522_v9 }
  0x17   : > { %291 = vrot.lane.b32.xlu1 %v2503_v3, %s2440_s21  ;;  %1218 = vmatpush1.bf16.msra.mxu1 %v2510_v6 }
  0x19   : > { %1096 = vmatpush1.bf16.msra.mxu0 %v2518_v8 }
  0x1a   : > { %289 = vrot.lane.b32.xlu0 %v2508_v5, %s2440_s21 }
  0x1b   : > { %305 = vrot.lane.b32.xlu1 %v2506_v4, %s2440_s21 }
  0x1e   : > { %307 = vrot.lane.b32.xlu0 %v2514_v7, %s2440_s21 }
  0x1f   : > { %303 = vrot.lane.b32.xlu1 %v2510_v6, %s2440_s21 }
  0x22   : > { %301 = vrot.lane.b32.xlu0 %v2522_v9, %s2440_s21 }
  0x23   : > { %299 = vrot.lane.b32.xlu1 %v2518_v8, %s2440_s21 }
  0x26   : > { %344 = vrot.lane.b32.xlu0 %v2494_v0, %s2441_s22 }
  0x27   : > { %346 = vrot.lane.b32.xlu1 %v2499_v2, %s2441_s22 }
  0x2a   : > { %342 = vrot.lane.b32.xlu0 %v2496_v1, %s2441_s22 }
  0x2b   : > { %340 = vrot.lane.b32.xlu1 %v2503_v3, %s2441_s22 }
  0x2e   : > { %338 = vrot.lane.b32.xlu0 %v2508_v5, %s2441_s22 }
  0x2f   : > { %354 = vrot.lane.b32.xlu1 %v2506_v4, %s2441_s22 }
  0x32   : > { %356 = vrot.lane.b32.xlu0 %v2514_v7, %s2441_s22 }
  0x33   : > { %352 = vrot.lane.b32.xlu1 %v2510_v6, %s2441_s22 }
  0x36   : > { %350 = vrot.lane.b32.xlu0 %v2522_v9, %s2441_s22 }
  0x37   : > { %348 = vrot.lane.b32.xlu1 %v2518_v8, %s2441_s22 }
  0x3a   : > { %393 = vrot.lane.b32.xlu0 %v2494_v0, %s2442_s23 }
  0x3b   : > { %395 = vrot.lane.b32.xlu1 %v2499_v2, %s2442_s23 }
  0x3e   : > { %391 = vrot.lane.b32.xlu0 %v2496_v1, %s2442_s23 }
  0x3f   : > { %389 = vrot.lane.b32.xlu1 %v2503_v3, %s2442_s23 }
  0x42   : > { %387 = vrot.lane.b32.xlu0 %v2508_v5, %s2442_s23 }
  0x43   : > { %403 = vrot.lane.b32.xlu1 %v2506_v4, %s2442_s23 }
  0x46   : > { %405 = vrot.lane.b32.xlu0 %v2514_v7, %s2442_s23 }
  0x47   : > { %401 = vrot.lane.b32.xlu1 %v2510_v6, %s2442_s23 }
  0x4a   : > { %399 = vrot.lane.b32.xlu0 %v2522_v9, %s2442_s23 }
  0x4b   : > { %397 = vrot.lane.b32.xlu1 %v2518_v8, %s2442_s23 }
  0x4e   : > { %442 = vrot.lane.b32.xlu0 %v2494_v0, %s2443_s24 }
  0x4f   : > { %444 = vrot.lane.b32.xlu1 %v2499_v2, %s2443_s24 }
  0x52   : > { %440 = vrot.lane.b32.xlu0 %v2496_v1, %s2443_s24 }
  0x53   : > { %438 = vrot.lane.b32.xlu1 %v2503_v3, %s2443_s24 }
  0x56   : > { %436 = vrot.lane.b32.xlu0 %v2508_v5, %s2443_s24 }
  0x57   : > { %452 = vrot.lane.b32.xlu1 %v2506_v4, %s2443_s24 }
  0x5a   : > { %454 = vrot.lane.b32.xlu0 %v2514_v7, %s2443_s24 }
  0x5b   : > { %450 = vrot.lane.b32.xlu1 %v2510_v6, %s2443_s24 }
  0x5e   : > { %448 = vrot.lane.b32.xlu0 %v2522_v9, %s2443_s24 }
  0x5f   : > { %446 = vrot.lane.b32.xlu1 %v2518_v8, %s2443_s24 }
  0x62   : > { %491 = vrot.lane.b32.xlu0 %v2494_v0, %s2444_s25 }
  0x63   : > { %493 = vrot.lane.b32.xlu1 %v2499_v2, %s2444_s25 }
  0x66   : > { %489 = vrot.lane.b32.xlu0 %v2496_v1, %s2444_s25 }
  0x67   : > { %487 = vrot.lane.b32.xlu1 %v2503_v3, %s2444_s25 }
  0x6a   : > { %485 = vrot.lane.b32.xlu0 %v2508_v5, %s2444_s25 }
  0x6b   : > { %501 = vrot.lane.b32.xlu1 %v2506_v4, %s2444_s25 }
  0x6e   : > { %503 = vrot.lane.b32.xlu0 %v2514_v7, %s2444_s25 }
  0x6f   : > { %499 = vrot.lane.b32.xlu1 %v2510_v6, %s2444_s25 }
  0x72   : > { %497 = vrot.lane.b32.xlu0 %v2522_v9, %s2444_s25 }
  0x73   : > { %495 = vrot.lane.b32.xlu1 %v2518_v8, %s2444_s25 }
  0x76   : > { %540 = vrot.lane.b32.xlu0 %v2494_v0, %s2445_s26 }
  0x77   : > { %542 = vrot.lane.b32.xlu1 %v2499_v2, %s2445_s26 }
  0x7a   : > { %538 = vrot.lane.b32.xlu0 %v2496_v1, %s2445_s26 }
  0x7b   : > { %536 = vrot.lane.b32.xlu1 %v2503_v3, %s2445_s26 }
  0x7e   : > { %534 = vrot.lane.b32.xlu0 %v2508_v5, %s2445_s26 }
  0x7f   : > { %550 = vrot.lane.b32.xlu1 %v2506_v4, %s2445_s26 }
  0x82   : > { %552 = vrot.lane.b32.xlu0 %v2514_v7, %s2445_s26 }
  0x83   : > { %548 = vrot.lane.b32.xlu1 %v2510_v6, %s2445_s26 }
  0x84   : > { %v296_v10 = vpop.permute.xlu0 %295 }
  0x85   : > { %v294_v11 = vpop.permute.xlu1 %293 }
  0x86   : > { %v312_v12 = vsel %vm309_vm1, %v294_v11, %v296_v10  ;;  %546 = vrot.lane.b32.xlu0 %v2522_v9, %s2445_s26 }
  0x87   : > { %544 = vrot.lane.b32.xlu1 %v2518_v8, %s2445_s26 }
  0x88   : > { %v298_v13 = vpop.permute.xlu0 %297 }
  0x89   : > { %v313_v14 = vsel %vm309_vm1, %v296_v10, %v298_v13  ;;  %332 = vst.msk [vmem:[#allocation2 + $0x70] sm:$0xff] %vm282_vm0, %v298_v13  ;;  %v292_v15 = vpop.permute.xlu1 %291 }
  0x8a   : > { %v311_v16 = vsel %vm309_vm1, %v292_v15, %v294_v11  ;;  %589 = vrot.lane.b32.xlu0 %v2494_v0, %s2446_s27  ;;  %1219 = vmatprep.subr.bf16.mxu1 %v313_v14 }
  0x8b   : > { %591 = vrot.lane.b32.xlu1 %v2499_v2, %s2446_s27  ;;  %1097 = vmatprep.subr.bf16.mxu0 %v311_v16 }
  0x8c   : > { %v290_v17 = vpop.permute.xlu0 %289  ;;  %1220 = vmatpush1.bf16.msra.mxu1 %v312_v12 }
  0x8d   : > { %v306_v18 = vpop.permute.xlu1 %305  ;;  %v310_v19 = vsel %vm309_vm1, %v290_v17, %v292_v15 }
  0x8e   : > { %587 = vrot.lane.b32.xlu0 %v2496_v1, %s2446_s27  ;;  %1098 = vmatpush1.bf16.msra.mxu0 %v310_v19 }
  0x8f   : > { %585 = vrot.lane.b32.xlu1 %v2503_v3, %s2446_s27 }
  0x90   : > { %v308_v20 = vpop.permute.xlu0 %307 }
  0x91   : > { %v304_v21 = vpop.permute.xlu1 %303  ;;  %v317_v22 = vsel %vm309_vm1, %v306_v18, %v308_v20  ;;  %337 = vst.msk [vmem:[#allocation2 + $0x98] sm:$0xff] %vm282_vm0, %v308_v20 }
  0x92   : > { %v316_v23 = vsel %vm309_vm1, %v304_v21, %v306_v18  ;;  %583 = vrot.lane.b32.xlu0 %v2508_v5, %s2446_s27  ;;  %1221 = vmatprep.subr.bf16.mxu1 %v317_v22 }
  0x93   : > { %599 = vrot.lane.b32.xlu1 %v2506_v4, %s2446_s27  ;;  %1222 = vmatpush1.bf16.msra.mxu1 %v316_v23 }
  0x94   : > { %v302_v24 = vpop.permute.xlu0 %301 }
  0x95   : > { %v300_v26 = vpop.permute.xlu1 %299  ;;  %v315_v27 = vsel %vm309_vm1, %v302_v24, %v304_v21 }
  0x96   : > { %v314_v28 = vsel %vm309_vm1, %v300_v26, %v302_v24  ;;  %601 = vrot.lane.b32.xlu0 %v2514_v7, %s2446_s27  ;;  %1099 = vmatprep.subr.bf16.mxu0 %v315_v27 }
  0x97   : > { %597 = vrot.lane.b32.xlu1 %v2510_v6, %s2446_s27  ;;  %1100 = vmatpush1.bf16.msra.mxu0 %v314_v28 }
  0x98   : > { %v345_v29 = vpop.permute.xlu0 %344 }
  0x99   : > { %v347_v30 = vpop.permute.xlu1 %346 }
  0x9a   : > { %381 = vst.msk [vmem:[#allocation2 + $0xc0] sm:$0xff] %vm282_vm0, %v347_v30  ;;  %v362_v31 = vsel %vm358_vm2, %v345_v29, %v347_v30  ;;  %595 = vrot.lane.b32.xlu0 %v2522_v9, %s2446_s27 }
  0x9b   : > { %593 = vrot.lane.b32.xlu1 %v2518_v8, %s2446_s27  ;;  %1223 = vmatprep.subr.bf16.mxu1 %v362_v31 }
  0x9c   : > { %v343_v32 = vpop.permute.xlu0 %342 }
  0x9d   : > { %v341_v33 = vpop.permute.xlu1 %340  ;;  %v361_v34 = vsel %vm358_vm2, %v343_v32, %v345_v29 }
  0x9e   : > { %v360_v35 = vsel %vm358_vm2, %v341_v33, %v343_v32  ;;  %638 = vrot.lane.b32.xlu0 %v2494_v0, %s2447_s30  ;;  %1224 = vmatpush1.bf16.msra.mxu1 %v361_v34 }
  0x9f   : > { %640 = vrot.lane.b32.xlu1 %v2499_v2, %s2447_s30  ;;  %1101 = vmatprep.subr.bf16.mxu0 %v360_v35 }
  0xa0   : > { %v339_v36 = vpop.permute.xlu0 %338 }
  0xa1   : > { %v355_v37 = vpop.permute.xlu1 %354  ;;  %v359_v38 = vsel %vm358_vm2, %v339_v36, %v341_v33 }
  0xa2   : > { %636 = vrot.lane.b32.xlu0 %v2496_v1, %s2447_s30  ;;  %1102 = vmatpush1.bf16.msra.mxu0 %v359_v38 }
  0xa3   : > { %634 = vrot.lane.b32.xlu1 %v2503_v3, %s2447_s30 }
  0xa4   : > { %v357_v39 = vpop.permute.xlu0 %356 }
  0xa5   : > { %v353_v40 = vpop.permute.xlu1 %352  ;;  %v366_v41 = vsel %vm358_vm2, %v355_v37, %v357_v39  ;;  %386 = vst.msk [vmem:[#allocation2 + $0xe8] sm:$0xff] %vm282_vm0, %v357_v39 }
  0xa6   : > { %v365_v42 = vsel %vm358_vm2, %v353_v40, %v355_v37  ;;  %632 = vrot.lane.b32.xlu0 %v2508_v5, %s2447_s30  ;;  %1225 = vmatprep.subr.bf16.mxu1 %v366_v41 }
  0xa7   : > { %648 = vrot.lane.b32.xlu1 %v2506_v4, %s2447_s30  ;;  %1226 = vmatpush1.bf16.msra.mxu1 %v365_v42 }
  0xa8   : > { %v351_v43 = vpop.permute.xlu0 %350 }
  0xa9   : > { %v349_v44 = vpop.permute.xlu1 %348  ;;  %v364_v45 = vsel %vm358_vm2, %v351_v43, %v353_v40 }
  0xaa   : > { %v363_v46 = vsel %vm358_vm2, %v349_v44, %v351_v43  ;;  %650 = vrot.lane.b32.xlu0 %v2514_v7, %s2447_s30  ;;  %1103 = vmatprep.subr.bf16.mxu0 %v364_v45 }
  0xab   : > { %646 = vrot.lane.b32.xlu1 %v2510_v6, %s2447_s30  ;;  %1104 = vmatpush1.bf16.msra.mxu0 %v363_v46 }
  0xac   : > { %v394_v47 = vpop.permute.xlu0 %393 }
  0xad   : > { %v396_v48 = vpop.permute.xlu1 %395 }
  0xae   : > { %430 = vst.msk [vmem:[#allocation2 + $0x110] sm:$0xff] %vm282_vm0, %v396_v48  ;;  %v411_v49 = vsel %vm407_vm3, %v394_v47, %v396_v48  ;;  %644 = vrot.lane.b32.xlu0 %v2522_v9, %s2447_s30 }
  0xaf   : > { %642 = vrot.lane.b32.xlu1 %v2518_v8, %s2447_s30  ;;  %1227 = vmatprep.subr.bf16.mxu1 %v411_v49 }
  0xb0   : > { %v392_v50 = vpop.permute.xlu0 %391 }
  0xb1   : > { %v390_v51 = vpop.permute.xlu1 %389  ;;  %v410_v52 = vsel %vm407_vm3, %v392_v50, %v394_v47 }
  0xb2   : > { %v409_v53 = vsel %vm407_vm3, %v390_v51, %v392_v50  ;;  %687 = vrot.lane.b32.xlu0 %v2494_v0, %s2448_s5  ;;  %1228 = vmatpush1.bf16.msra.mxu1 %v410_v52 }
  0xb3   : > { %689 = vrot.lane.b32.xlu1 %v2499_v2, %s2448_s5  ;;  %1105 = vmatprep.subr.bf16.mxu0 %v409_v53 }
  0xb4   : > { %v388_v54 = vpop.permute.xlu0 %387 }
  0xb5   : > { %v404_v55 = vpop.permute.xlu1 %403  ;;  %v408_v56 = vsel %vm407_vm3, %v388_v54, %v390_v51 }
  0xb6   : > { %685 = vrot.lane.b32.xlu0 %v2496_v1, %s2448_s5  ;;  %1106 = vmatpush1.bf16.msra.mxu0 %v408_v56 }
  0xb7   : > { %683 = vrot.lane.b32.xlu1 %v2503_v3, %s2448_s5 }
  0xb8   : > { %v406_v57 = vpop.permute.xlu0 %405 }
  0xb9   : > { %v402_v58 = vpop.permute.xlu1 %401  ;;  %v415_v59 = vsel %vm407_vm3, %v404_v55, %v406_v57  ;;  %435 = vst.msk [vmem:[#allocation2 + $0x138] sm:$0xff] %vm282_vm0, %v406_v57  ;;  %v2452_v57 = vmov 0  }
  0xba   : > { %v414_v60 = vsel %vm407_vm3, %v402_v58, %v404_v55  ;;  %681 = vrot.lane.b32.xlu0 %v2508_v5, %s2448_s5  ;;  %1229 = vmatprep.subr.bf16.mxu1 %v415_v59 }
  0xbb   : > { %697 = vrot.lane.b32.xlu1 %v2506_v4, %s2448_s5  ;;  %1230 = vmatpush1.bf16.msra.mxu1 %v414_v60 }
  0xbc   : > { %v400_v61 = vpop.permute.xlu0 %399  ;;  %2354 = vset.pattern.permute.xlu0 %v2452_v57  ;;  %2355 = vset.pattern.permute.xlu1 %v2452_v57 }
  0xbd   : > { %v398_v62 = vpop.permute.xlu1 %397  ;;  %v413_v63 = vsel %vm407_vm3, %v400_v61, %v402_v58 }
  0xbe   : > { %v412_v10 = vsel %vm407_vm3, %v398_v62, %v400_v61  ;;  %699 = vrot.lane.b32.xlu0 %v2514_v7, %s2448_s5  ;;  %1107 = vmatprep.subr.bf16.mxu0 %v413_v63 }
  0xbf   : > { %695 = vrot.lane.b32.xlu1 %v2510_v6, %s2448_s5  ;;  %1108 = vmatpush1.bf16.msra.mxu0 %v412_v10 }
  0xc0   : > { %v443_v11 = vpop.permute.xlu0 %442 }
  0xc1   : > { %v445_v12 = vpop.permute.xlu1 %444 }
  0xc2   : > { %479 = vst.msk [vmem:[#allocation2 + $0x160] sm:$0xff] %vm282_vm0, %v445_v12  ;;  %v460_v13 = vsel %vm456_vm4, %v443_v11, %v445_v12  ;;  %693 = vrot.lane.b32.xlu0 %v2522_v9, %s2448_s5 }
  0xc3   : > { %691 = vrot.lane.b32.xlu1 %v2518_v8, %s2448_s5  ;;  %1231 = vmatprep.subr.bf16.mxu1 %v460_v13 }
  0xc4   : > { %v441_v14 = vpop.permute.xlu0 %440 }
  0xc5   : > { %v439_v15 = vpop.permute.xlu1 %438  ;;  %v459_v16 = vsel %vm456_vm4, %v441_v14, %v443_v11 }
  0xc6   : > { %v458_v17 = vsel %vm456_vm4, %v439_v15, %v441_v14  ;;  %736 = vrot.lane.b32.xlu0 %v2494_v0, %s2449_s6  ;;  %1232 = vmatpush1.bf16.msra.mxu1 %v459_v16  ;;  %v2782_v16 = vld [vmem:[%s3123_s1] ss:$16 sps:$4 sm:$0xff]  }
  0xc7   : > { %738 = vrot.lane.b32.xlu1 %v2499_v2, %s2449_s6  ;;  %1109 = vmatprep.subr.bf16.mxu0 %v458_v17  ;;  %v2787_v17 = vld [vmem:[%s3123_s1 + $0x24] ss:$16 sps:$4 sm:$0xff]  }
  0xc8   : > { %v437_v18 = vpop.permute.xlu0 %436 }
  0xc9   : > { %v453_v19 = vpop.permute.xlu1 %452  ;;  %v457_v20 = vsel %vm456_vm4, %v437_v18, %v439_v15 }
  0xca   : > { %734 = vrot.lane.b32.xlu0 %v2496_v1, %s2449_s6  ;;  %1110 = vmatpush1.bf16.msra.mxu0 %v457_v20 }
  0xcb   : > { %732 = vrot.lane.b32.xlu1 %v2503_v3, %s2449_s6 }
  0xcc   : > { %v455_v21 = vpop.permute.xlu0 %454 }
  0xcd   : > { %v451_v22 = vpop.permute.xlu1 %450  ;;  %v464_v23 = vsel %vm456_vm4, %v453_v19, %v455_v21  ;;  %484 = vst.msk [vmem:[#allocation2 + $0x188] sm:$0xff] %vm282_vm0, %v455_v21 }
  0xce   : > { %v463_v24 = vsel %vm456_vm4, %v451_v22, %v453_v19  ;;  %730 = vrot.lane.b32.xlu0 %v2508_v5, %s2449_s6  ;;  %1233 = vmatprep.subr.bf16.mxu1 %v464_v23 }
  0xcf   : > { %746 = vrot.lane.b32.xlu1 %v2506_v4, %s2449_s6  ;;  %1234 = vmatpush1.bf16.msra.mxu1 %v463_v24  ;;  %v207_v24 = vld [vmem:[%s3123_s1 + $0x40] sm:$0xff] }
  0xd0   : > { %v449_v25 = vpop.permute.xlu0 %448 }
  0xd1   : > { %v447_v26 = vpop.permute.xlu1 %446  ;;  %v462_v27 = vsel %vm456_vm4, %v449_v25, %v451_v22 }
  0xd2   : > { %v461_v28 = vsel %vm456_vm4, %v447_v26, %v449_v25  ;;  %748 = vrot.lane.b32.xlu0 %v2514_v7, %s2449_s6  ;;  %1111 = vmatprep.subr.bf16.mxu0 %v462_v27  ;;  %v2802_v26 = vld [vmem:[%s3123_s1 + $0x20] ss:$16 sps:$4 sm:$0xff]  }
  0xd3   : > { %744 = vrot.lane.b32.xlu1 %v2510_v6, %s2449_s6  ;;  %1112 = vmatpush1.bf16.msra.mxu0 %v461_v28  ;;  %v2805_v28 = vcombine.high %v207_v24, %v207_v24 }
  0xd4   : > { %v492_v29 = vpop.permute.xlu0 %491 }
  0xd5   : > { %v494_v30 = vpop.permute.xlu1 %493 }
  0xd6   : > { %528 = vst.msk [vmem:[#allocation2 + $0x1b0] sm:$0xff] %vm282_vm0, %v494_v30  ;;  %v509_v31 = vsel %vm505_vm5, %v492_v29, %v494_v30  ;;  %742 = vrot.lane.b32.xlu0 %v2522_v9, %s2449_s6 }
  0xd7   : > { %740 = vrot.lane.b32.xlu1 %v2518_v8, %s2449_s6  ;;  %1235 = vmatprep.subr.bf16.mxu1 %v509_v31 }
  0xd8   : > { %v490_v32 = vpop.permute.xlu0 %489 }
  0xd9   : > { %v488_v33 = vpop.permute.xlu1 %487  ;;  %v508_v34 = vsel %vm505_vm5, %v490_v32, %v492_v29 }
  0xda   : > { %v507_v35 = vsel %vm505_vm5, %v488_v33, %v490_v32  ;;  %785 = vrot.lane.b32.xlu0 %v2494_v0, %s2450_s7  ;;  %1236 = vmatpush1.bf16.msra.mxu1 %v508_v34 }
  0xdb   : > { %787 = vrot.lane.b32.xlu1 %v2499_v2, %s2450_s7  ;;  %1113 = vmatprep.subr.bf16.mxu0 %v507_v35 }
  0xdc   : > { %v486_v36 = vpop.permute.xlu0 %485 }
  0xdd   : > { %v502_v37 = vpop.permute.xlu1 %501  ;;  %v506_v38 = vsel %vm505_vm5, %v486_v36, %v488_v33  ;;  %v2813_v36 = vcombine.low %v207_v24, %v207_v24 }
  0xde   : > { %783 = vrot.lane.b32.xlu0 %v2496_v1, %s2450_s7  ;;  %1114 = vmatpush1.bf16.msra.mxu0 %v506_v38 }
  0xdf   : > { %781 = vrot.lane.b32.xlu1 %v2503_v3, %s2450_s7 }
  0xe0   : > { %v504_v39 = vpop.permute.xlu0 %503 }
  0xe1   : > { %v500_v40 = vpop.permute.xlu1 %499  ;;  %v513_v41 = vsel %vm505_vm5, %v502_v37, %v504_v39  ;;  %533 = vst.msk [vmem:[#allocation2 + $0x1d8] sm:$0xff] %vm282_vm0, %v504_v39  ;;  %v2821_v39 = vld [vmem:[%s3123_s1 + $0xc] ss:$16 sps:$4 sm:$0xff]  }
  0xe2   : > { %v512_v42 = vsel %vm505_vm5, %v500_v40, %v502_v37  ;;  %779 = vrot.lane.b32.xlu0 %v2508_v5, %s2450_s7  ;;  %1237 = vmatprep.subr.bf16.mxu1 %v513_v41 }
  0xe3   : > { %795 = vrot.lane.b32.xlu1 %v2506_v4, %s2450_s7  ;;  %1238 = vmatpush1.bf16.msra.mxu1 %v512_v42 }
  0xe4   : > { %v498_v43 = vpop.permute.xlu0 %497 }
  0xe5   : > { %v496_v44 = vpop.permute.xlu1 %495  ;;  %v511_v45 = vsel %vm505_vm5, %v498_v43, %v500_v40 }
  0xe6   : > { %v510_v46 = vsel %vm505_vm5, %v496_v44, %v498_v43  ;;  %797 = vrot.lane.b32.xlu0 %v2514_v7, %s2450_s7  ;;  %1115 = vmatprep.subr.bf16.mxu0 %v511_v45 }
  0xe7   : > { %793 = vrot.lane.b32.xlu1 %v2510_v6, %s2450_s7  ;;  %1116 = vmatpush1.bf16.msra.mxu0 %v510_v46 }
  0xe8   : > { %v541_v47 = vpop.permute.xlu0 %540 }
  0xe9   : > { %v543_v48 = vpop.permute.xlu1 %542 }
  0xea   : > { %577 = vst.msk [vmem:[#allocation2 + $0x200] sm:$0xff] %vm282_vm0, %v543_v48  ;;  %v558_v49 = vsel %vm554_vm6, %v541_v47, %v543_v48  ;;  %791 = vrot.lane.b32.xlu0 %v2522_v9, %s2450_s7 }
  0xeb   : > { %789 = vrot.lane.b32.xlu1 %v2518_v8, %s2450_s7  ;;  %1239 = vmatprep.subr.bf16.mxu1 %v558_v49 }
  0xec   : > { %v539_v50 = vpop.permute.xlu0 %538 }
  0xed   : > { %v537_v51 = vpop.permute.xlu1 %536  ;;  %v557_v52 = vsel %vm554_vm6, %v539_v50, %v541_v47 }
  0xee   : > { %v556_v53 = vsel %vm554_vm6, %v537_v51, %v539_v50  ;;  %834 = vrot.lane.b32.xlu0 %v2494_v0, %s2451_s8  ;;  %1240 = vmatpush1.bf16.msra.mxu1 %v557_v52  ;;  %v209_v52 = vld [vmem:[%s3124_s2] sm:$0xff] }
  0xef   : > { %836 = vrot.lane.b32.xlu1 %v2499_v2, %s2451_s8  ;;  %1117 = vmatprep.subr.bf16.mxu0 %v556_v53  ;;  %v210_v53 = vld [vmem:[%s3124_s2 + $0x8] sm:$0xff] }
  0xf0   : > { %v535_v54 = vpop.permute.xlu0 %534 }
  0xf1   : > { %v551_v55 = vpop.permute.xlu1 %550  ;;  %v555_v56 = vsel %vm554_vm6, %v535_v54, %v537_v51 }
  0xf2   : > { %832 = vrot.lane.b32.xlu0 %v2496_v1, %s2451_s8  ;;  %1118 = vmatpush1.bf16.msra.mxu0 %v555_v56 }
  0xf3   : > { %830 = vrot.lane.b32.xlu1 %v2503_v3, %s2451_s8 }
  0xf4   : > { %v553_v0 = vpop.permute.xlu0 %552 }
  0xf5   : > { %v549_v58 = vpop.permute.xlu1 %548  ;;  %v562_v2 = vsel %vm554_vm6, %v551_v55, %v553_v0  ;;  %582 = vst.msk [vmem:[#allocation2 + $0x228] sm:$0xff] %vm282_vm0, %v553_v0 }
  0xf6   : > { %v561_v59 = vsel %vm554_vm6, %v549_v58, %v551_v55  ;;  %828 = vrot.lane.b32.xlu0 %v2508_v5, %s2451_s8  ;;  %1241 = vmatprep.subr.bf16.mxu1 %v562_v2  ;;  %v212_v55 = vld [vmem:[%s3124_s2 + $0x18] sm:$0xff] }
  0xf7   : > { %844 = vrot.lane.b32.xlu1 %v2506_v4, %s2451_s8  ;;  %1242 = vmatpush1.bf16.msra.mxu1 %v561_v59 }
  0xf8   : > { %v547_v1 = vpop.permute.xlu0 %546 }
  0xf9   : > { %v545_v3 = vpop.permute.xlu1 %544  ;;  %v560_v60 = vsel %vm554_vm6, %v547_v1, %v549_v58  ;;  %v211_v58 = vld [vmem:[%s3124_s2 + $0x10] sm:$0xff] }
  0xfa   : > { %v559_v61 = vsel %vm554_vm6, %v545_v3, %v547_v1  ;;  %846 = vrot.lane.b32.xlu0 %v2514_v7, %s2451_s8  ;;  %1119 = vmatprep.subr.bf16.mxu0 %v560_v60  ;;  %v213_v3 = vld [vmem:[%s3124_s2 + $0x20] sm:$0xff] }
  0xfb   : > { %842 = vrot.lane.b32.xlu1 %v2510_v6, %s2451_s8  ;;  %1120 = vmatpush1.bf16.msra.mxu0 %v559_v61 }
  0xfc   : > { %v590_v5 = vpop.permute.xlu0 %589 }
  0xfd   : > { %v592_v62 = vpop.permute.xlu1 %591 }
  0xfe   : > { %626 = vst.msk [vmem:[#allocation2 + $0x250] sm:$0xff] %vm282_vm0, %v592_v62  ;;  %v607_v4 = vsel %vm603_vm7, %v590_v5, %v592_v62  ;;  %840 = vrot.lane.b32.xlu0 %v2522_v9, %s2451_s8 }
  0xff   : > { %838 = vrot.lane.b32.xlu1 %v2518_v8, %s2451_s8  ;;  %1243 = vmatprep.subr.bf16.mxu1 %v607_v4 }
 0x100   : > { %v588_v7 = vpop.permute.xlu0 %587 }
 0x101   : > { %v586_v63 = vpop.permute.xlu1 %585  ;;  %v606_v10 = vsel %vm603_vm7, %v588_v7, %v590_v5 }
 0x102   : > { %v605_v6 = vsel %vm603_vm7, %v586_v63, %v588_v7  ;;  %1244 = vmatpush1.bf16.msra.mxu1 %v606_v10  ;;  %1009 = vperm.xlu0 %2354, %v209_v52  }
 0x103   : > { %1121 = vmatprep.subr.bf16.mxu0 %v605_v6  ;;  %1014 = vperm.xlu1 %2355, %v210_v53  }
 0x104   : > { %v584_v11 = vpop.permute.xlu0 %583 }
 0x105   : > { %v600_v12 = vpop.permute.xlu1 %599  ;;  %v604_v13 = vsel %vm603_vm7, %v584_v11, %v586_v63 }
 0x106   : > { %1122 = vmatpush1.bf16.msra.mxu0 %v604_v13  ;;  %1024 = vperm.xlu0 %2354, %v212_v55  }
 0x107   : > { %1019 = vperm.xlu1 %2355, %v211_v58  }
 0x108   : > { %v602_v14 = vpop.permute.xlu0 %601 }
 0x109   : > { %v598_v15 = vpop.permute.xlu1 %597  ;;  %v611_v9 = vsel %vm603_vm7, %v600_v12, %v602_v14  ;;  %631 = vst.msk [vmem:[#allocation2 + $0x278] sm:$0xff] %vm282_vm0, %v602_v14 }
 0x10a   : > { %v610_v8 = vsel %vm603_vm7, %v598_v15, %v600_v12  ;;  %1245 = vmatprep.subr.bf16.mxu1 %v611_v9 }
 0x10b   : > { %1246 = vmatpush1.bf16.msra.mxu1 %v610_v8  ;;  %1029 = vperm.xlu1 %2355, %v213_v3  }
 0x10c   : > { %v596_v18 = vpop.permute.xlu0 %595 }
 0x10d   : > { %v594_v19 = vpop.permute.xlu1 %593  ;;  %v609_v20 = vsel %vm603_vm7, %v596_v18, %v598_v15 }
 0x10e   : > { %v608_v21 = vsel %vm603_vm7, %v594_v19, %v596_v18  ;;  %1123 = vmatprep.subr.bf16.mxu0 %v609_v20  ;;  %1248 = vmatmul.mubr.bf16.vlgmr.msra.gmra.mrb[0].mxu1 %v2782_v16 }
 0x10f   : > { %1124 = vmatpush1.bf16.msra.mxu0 %v608_v21  ;;  %1257 = vmatprep.mubr.bf16.mxu1 %v2787_v17 }
 0x110   : > { %v639_v22 = vpop.permute.xlu0 %638 }
 0x111   : > { %v641_v23 = vpop.permute.xlu1 %640 }
 0x112   : > { %675 = vst.msk [vmem:[#allocation2 + $0x2a0] sm:$0xff] %vm282_vm0, %v641_v23  ;;  %v656_v25 = vsel %vm652_vm8, %v639_v22, %v641_v23  ;;  %1126 = vmatmul.mubr.bf16.vlgmr.msra.gmra.mrb[0].mxu0 %v2782_v16 }
 0x113   : > { %1276 = vmatprep.subr.bf16.mxu1 %v656_v25  ;;  %1135 = vmatprep.mubr.bf16.mxu0 %v2787_v17 }
 0x114   : > { %v637_v27 = vpop.permute.xlu0 %636 }
 0x115   : > { %v635_v29 = vpop.permute.xlu1 %634  ;;  %v655_v30 = vsel %vm652_vm8, %v637_v27, %v639_v22 }
 0x116   : > { %v654_v31 = vsel %vm652_vm8, %v635_v29, %v637_v27  ;;  %1277 = vmatpush1.bf16.msra.mxu1 %v655_v30 }
 0x117   : > { %1154 = vmatprep.subr.bf16.mxu0 %v654_v31  ;;  %1258 = vmatmul.mubr.bf16.gmra.mrb[4].mxu1 %v2802_v26 }
 0x118   : > { %v633_v32 = vpop.permute.xlu0 %632  ;;  %1267 = vmatprep.mubr.bf16.mxu1 %v2805_v28 }
 0x119   : > { %v649_v33 = vpop.permute.xlu1 %648  ;;  %v653_v34 = vsel %vm652_vm8, %v633_v32, %v635_v29 }
 0x11a   : > { %1155 = vmatpush1.bf16.msra.mxu0 %v653_v34 }
 0x11b   : > { %1136 = vmatmul.mubr.bf16.gmra.mrb[4].mxu0 %v2802_v26 }
 0x11c   : > { %v651_v35 = vpop.permute.xlu0 %650  ;;  %1145 = vmatprep.mubr.bf16.mxu0 %v2805_v28 }
 0x11d   : > { %v647_v37 = vpop.permute.xlu1 %646  ;;  %v660_v38 = vsel %vm652_vm8, %v649_v33, %v651_v35  ;;  %680 = vst.msk [vmem:[#allocation2 + $0x2c8] sm:$0xff] %vm282_vm0, %v651_v35 }
 0x11e   : > { %v659_v40 = vsel %vm652_vm8, %v647_v37, %v649_v33  ;;  %1278 = vmatprep.subr.bf16.mxu1 %v660_v38 }
 0x11f   : > { %1279 = vmatpush1.bf16.msra.mxu1 %v659_v40 }
 0x120   : > { %v645_v41 = vpop.permute.xlu0 %644  ;;  %1268 = vmatmul.mubr.bf16.gmra.mrb[8].mxu1 %v2813_v36 }
 0x121   : > { %v643_v42 = vpop.permute.xlu1 %642  ;;  %v658_v43 = vsel %vm652_vm8, %v645_v41, %v647_v37  ;;  %2107 = vmatprep.mubr.msk.bf16.mxu1 %vm1083_vm9, %v2821_v39 }
 0x122   : > { %v657_v44 = vsel %vm652_vm8, %v643_v42, %v645_v41  ;;  %1156 = vmatprep.subr.bf16.mxu0 %v658_v43 }
 0x123   : > { %1157 = vmatpush1.bf16.msra.mxu0 %v657_v44 }
 0x124   : > { %v688_v45 = vpop.permute.xlu0 %687  ;;  %1146 = vmatmul.mubr.bf16.gmra.mrb[8].mxu0 %v2813_v36 }
 0x125   : > { %v690_v46 = vpop.permute.xlu1 %689  ;;  %2104 = vmatprep.mubr.msk.bf16.mxu0 %vm1083_vm9, %v2821_v39 }
 0x126   : > { %724 = vst.msk [vmem:[#allocation2 + $0x2f0] sm:$0xff] %vm282_vm0, %v690_v46  ;;  %v705_v47 = vsel %vm701_vm10, %v688_v45, %v690_v46 }
 0x127   : > { %1280 = vmatprep.subr.bf16.mxu1 %v705_v47 }
 0x128   : > { %v686_v48 = vpop.permute.xlu0 %685 }
 0x129   : > { %v684_v49 = vpop.permute.xlu1 %683  ;;  %v704_v50 = vsel %vm701_vm10, %v686_v48, %v688_v45 }
 0x12a   : > { %v703_v51 = vsel %vm701_vm10, %v684_v49, %v686_v48  ;;  %1281 = vmatpush1.bf16.msra.mxu1 %v704_v50 }
 0x12b   : > { %1158 = vmatprep.subr.bf16.mxu0 %v703_v51 }
 0x12c   : > { %v682_v54 = vpop.permute.xlu0 %681 }
 0x12d   : > { %v698_v56 = vpop.permute.xlu1 %697  ;;  %v702_v0 = vsel %vm701_vm10, %v682_v54, %v684_v49 }
 0x12e   : > { %1159 = vmatpush1.bf16.msra.mxu0 %v702_v0 }
 0x130   : > { %v700_v2 = vpop.permute.xlu0 %699 }
 0x131   : > { %v696_v59 = vpop.permute.xlu1 %695  ;;  %v709_v1 = vsel %vm701_vm10, %v698_v56, %v700_v2  ;;  %729 = vst.msk [vmem:[#allocation2 + $0x318] sm:$0xff] %vm282_vm0, %v700_v2 }
 0x132   : > { %v708_v60 = vsel %vm701_vm10, %v696_v59, %v698_v56  ;;  %1282 = vmatprep.subr.bf16.mxu1 %v709_v1  ;;  %v2888_v1 = vld [vmem:[%s3123_s1 + $0x8] ss:$16 sps:$4 sm:$0xff]  }
 0x133   : > { %1283 = vmatpush1.bf16.msra.mxu1 %v708_v60 }
 0x134   : > { %v694_v61 = vpop.permute.xlu0 %693 }
 0x135   : > { %v692_v5 = vpop.permute.xlu1 %691  ;;  %v707_v62 = vsel %vm701_vm10, %v694_v61, %v696_v59 }
 0x136   : > { %v706_v4 = vsel %vm701_vm10, %v692_v5, %v694_v61  ;;  %1160 = vmatprep.subr.bf16.mxu0 %v707_v62  ;;  %v2895_v5 = vld [vmem:[%s3123_s1 + $0x2c] ss:$16 sps:$4 sm:$0xff]  }
 0x137   : > { %1161 = vmatpush1.bf16.msra.mxu0 %v706_v4  ;;  %v961_v4 = vld [vmem:[#allocation2 + $0x2a0] sm:$0xff] }
 0x138   : > { %v737_v7 = vpop.permute.xlu0 %736 }
 0x139   : > { %v739_v63 = vpop.permute.xlu1 %738 }
 0x13a   : > { %773 = vst.msk [vmem:[#allocation2 + $0x340] sm:$0xff] %vm282_vm0, %v739_v63  ;;  %v754_v10 = vsel %vm750_vm11, %v737_v7, %v739_v63  ;;  %v881_v63 = vld [vmem:[#allocation2 + $0x20] sm:$0xff] }
 0x13b   : > { %1284 = vmatprep.subr.bf16.mxu1 %v754_v10  ;;  %v966_v10 = vld [vmem:[#allocation2 + $0x2c8] sm:$0xff] }
 0x13c   : > { %v735_v6 = vpop.permute.xlu0 %734 }
 0x13d   : > { %v733_v11 = vpop.permute.xlu1 %732  ;;  %v753_v12 = vsel %vm750_vm11, %v735_v6, %v737_v7  ;;  %v921_v7 = vld [vmem:[#allocation2 + $0x160] sm:$0xff] }
 0x13e   : > { %v752_v13 = vsel %vm750_vm11, %v733_v11, %v735_v6  ;;  %1285 = vmatpush1.bf16.msra.mxu1 %v753_v12  ;;  %v2906_v6 = vld [vmem:[%s3123_s1 + $0x28] ss:$16 sps:$4 sm:$0xff]  }
 0x13f   : > { %1162 = vmatprep.subr.bf16.mxu0 %v752_v13  ;;  %v926_v12 = vld [vmem:[#allocation2 + $0x188] sm:$0xff] }
 0x140   : > { %v731_v14 = vpop.permute.xlu0 %730  ;;  %v886_v13 = vld [vmem:[#allocation2 + $0x48] sm:$0xff] }
 0x141   : > { %v747_v15 = vpop.permute.xlu1 %746  ;;  %v751_v9 = vsel %vm750_vm11, %v731_v14, %v733_v11  ;;  %v208_v11 = vld [vmem:[%s3123_s1 + $0x48] sm:$0xff] }
 0x142   : > { %1163 = vmatpush1.bf16.msra.mxu0 %v751_v9  ;;  %v2914_v14 = vcombine.high %v208_v11, %v208_v11  ;;  %v931_v9 = vld [vmem:[#allocation2 + $0x1b0] sm:$0xff] }
 0x144   : > { %v749_v8 = vpop.permute.xlu0 %748 }
 0x145   : > { %v745_v18 = vpop.permute.xlu1 %744  ;;  %v758_v19 = vsel %vm750_vm11, %v747_v15, %v749_v8  ;;  %778 = vst.msk [vmem:[#allocation2 + $0x368] sm:$0xff] %vm282_vm0, %v749_v8  ;;  %v891_v8 = vld [vmem:[#allocation2 + $0x70] sm:$0xff] }
 0x146   : > { %v757_v20 = vsel %vm750_vm11, %v745_v18, %v747_v15  ;;  %1286 = vmatprep.subr.bf16.mxu1 %v758_v19  ;;  %v971_v15 = vld [vmem:[#allocation2 + $0x2f0] sm:$0xff]  ;;  %v2921_v19 = vcombine.low %v208_v11, %v208_v11 }
 0x147   : > { %1287 = vmatpush1.bf16.msra.mxu1 %v757_v20  ;;  %v936_v20 = vld [vmem:[#allocation2 + $0x1d8] sm:$0xff] }
 0x148   : > { %v743_v21 = vpop.permute.xlu0 %742 }
 0x149   : > { %v741_v22 = vpop.permute.xlu1 %740  ;;  %v756_v23 = vsel %vm750_vm11, %v743_v21, %v745_v18  ;;  %v976_v18 = vld [vmem:[#allocation2 + $0x318] sm:$0xff] }
 0x14a   : > { %v755_v24 = vsel %vm750_vm11, %v741_v22, %v743_v21  ;;  %1164 = vmatprep.subr.bf16.mxu0 %v756_v23  ;;  %v896_v21 = vld [vmem:[#allocation2 + $0x98] sm:$0xff]  ;;  %v981_v22 = vld [vmem:[#allocation2 + $0x340] sm:$0xff] }
 0x14b   : > { %1165 = vmatpush1.bf16.msra.mxu0 %v755_v24  ;;  %v941_v23 = vld [vmem:[#allocation2 + $0x200] sm:$0xff] }
 0x14c   : > { %v786_v25 = vpop.permute.xlu0 %785  ;;  %v901_v24 = vld [vmem:[#allocation2 + $0xc0] sm:$0xff] }
 0x14d   : > { %v788_v27 = vpop.permute.xlu1 %787 }
 0x14e   : > { %822 = vst.msk [vmem:[#allocation2 + $0x390] sm:$0xff] %vm282_vm0, %v788_v27  ;;  %v803_v29 = vsel %vm799_vm12, %v786_v25, %v788_v27  ;;  %v946_v27 = vld [vmem:[#allocation2 + $0x228] sm:$0xff] }
 0x14f   : > { %1288 = vmatprep.subr.bf16.mxu1 %v803_v29  ;;  %v2431_v29 = vld [vmem:[%s3123_s1 + $0x4] ss:$16 sps:$4 sm:$0xff]  }
 0x150   : > { %v784_v30 = vpop.permute.xlu0 %783 }
 0x151   : > { %v782_v31 = vpop.permute.xlu1 %781  ;;  %v802_v32 = vsel %vm799_vm12, %v784_v30, %v786_v25  ;;  %v986_v25 = vld [vmem:[#allocation2 + $0x368] sm:$0xff] }
 0x152   : > { %v801_v33 = vsel %vm799_vm12, %v782_v31, %v784_v30  ;;  %1289 = vmatpush1.bf16.msra.mxu1 %v802_v32  ;;  %v906_v30 = vld [vmem:[#allocation2 + $0xe8] sm:$0xff]  ;;  %v911_v32 = vld [vmem:[#allocation2 + $0x110] sm:$0xff] }
 0x153   : > { %1166 = vmatprep.subr.bf16.mxu0 %v801_v33 }
 0x154   : > { %v780_v34 = vpop.permute.xlu0 %779 }
 0x155   : > { %v796_v35 = vpop.permute.xlu1 %795  ;;  %v800_v37 = vsel %vm799_vm12, %v780_v34, %v782_v31  ;;  %v991_v31 = vld [vmem:[#allocation2 + $0x390] sm:$0xff]  ;;  %v956_v34 = vld [vmem:[#allocation2 + $0x278] sm:$0xff] }
 0x156   : > { %1167 = vmatpush1.bf16.msra.mxu0 %v800_v37  ;;  %v916_v37 = vld [vmem:[#allocation2 + $0x138] sm:$0xff] }
 0x158   : > { %v798_v38 = vpop.permute.xlu0 %797 }
 0x159   : > { %v794_v40 = vpop.permute.xlu1 %793  ;;  %v807_v41 = vsel %vm799_vm12, %v796_v35, %v798_v38  ;;  %827 = vst.msk [vmem:[#allocation2 + $0x3b8] sm:$0xff] %vm282_vm0, %v798_v38 }
 0x15a   : > { %v806_v42 = vsel %vm799_vm12, %v794_v40, %v796_v35  ;;  %1290 = vmatprep.subr.bf16.mxu1 %v807_v41  ;;  %v2388_v35 = vld [vmem:[%s3125_s3 + $0x40] sm:$0xff]  }
 0x15b   : > { %1291 = vmatpush1.bf16.msra.mxu1 %v806_v42  ;;  %v2390_v41 = vld [vmem:[%s3125_s3] sm:$0xff]   ;;  %v2392_v42 = vld [vmem:[%s3125_s3 + $0x48] sm:$0xff]  }
 0x15c   : > { %v792_v43 = vpop.permute.xlu0 %791 }
 0x15d   : > { %v790_v44 = vpop.permute.xlu1 %789  ;;  %v805_v45 = vsel %vm799_vm12, %v792_v43, %v794_v40  ;;  %v2386_v40 = vld [vmem:[%s3125_s3 + $0xc0] sm:$0xff]  }
 0x15e   : > { %v804_v46 = vsel %vm799_vm12, %v790_v44, %v792_v43  ;;  %1168 = vmatprep.subr.bf16.mxu0 %v805_v45  ;;  %v2389_v44 = vld [vmem:[%s3125_s3 + $0xc8] sm:$0xff]  }
 0x15f   : > { %1169 = vmatpush1.bf16.msra.mxu0 %v804_v46  ;;  %v2394_v45 = vld [vmem:[%s3125_s3 + $0x8] sm:$0xff]   ;;  %v2393_v46 = vld [vmem:[%s3125_s3 + $0xd0] sm:$0xff]  }
 0x160   : > { %v835_v47 = vpop.permute.xlu0 %834  ;;  %v996_v33 = vld [vmem:[#allocation2 + $0x3b8] sm:$0xff] }
 0x161   : > { %v837_v48 = vpop.permute.xlu1 %836 }
 0x162   : > { %871 = vst.msk [vmem:[#allocation2 + $0x3e0] sm:$0xff] %vm282_vm0, %v837_v48  ;;  %v852_v49 = vsel %vm848_vm13, %v835_v47, %v837_v48  ;;  %v2397_v48 = vld [vmem:[%s3125_s3 + $0xd8] sm:$0xff]  }
 0x163   : > { %1292 = vmatprep.subr.bf16.mxu1 %v852_v49  ;;  %v2400_v49 = vld [vmem:[%s3125_s3 + $0x58] sm:$0xff]  }
 0x164   : > { %v833_v50 = vpop.permute.xlu0 %832 }
 0x165   : > { %v831_v51 = vpop.permute.xlu1 %830  ;;  %v851_v52 = vsel %vm848_vm13, %v833_v50, %v835_v47  ;;  %v2395_v47 = vld [vmem:[%s3125_s3 + $0x90] sm:$0xff]  }
 0x166   : > { %v850_v53 = vsel %vm848_vm13, %v831_v51, %v833_v50  ;;  %1293 = vmatpush1.bf16.msra.mxu1 %v851_v52  ;;  %v2402_v50 = vld [vmem:[%s3125_s3 + $0x18] sm:$0xff]   ;;  %v2404_v52 = vld [vmem:[%s3125_s3 + $0x60] sm:$0xff]  }
 0x167   : > { %1170 = vmatprep.subr.bf16.mxu0 %v850_v53  ;;  %v2405_v53 = vld [vmem:[%s3125_s3 + $0xe8] sm:$0xff]  }
 0x168   : > { %v829_v54 = vpop.permute.xlu0 %828 }
 0x169   : > { %v845_v55 = vpop.permute.xlu1 %844  ;;  %v849_v56 = vsel %vm848_vm13, %v829_v54, %v831_v51  ;;  %v1001_v38 = vld [vmem:[#allocation2 + $0x3e0] sm:$0xff] }
 0x16a   : > { %1171 = vmatpush1.bf16.msra.mxu0 %v849_v56  ;;  %v2403_v51 = vld [vmem:[%s3125_s3 + $0xa0] sm:$0xff]   ;;  %v2408_v56 = vld [vmem:[%s3125_s3 + $0x68] sm:$0xff]  }
 0x16b   : > { %v2406_v54 = vld [vmem:[%s3125_s3 + $0x20] sm:$0xff]  }
 0x16c   : > { %v847_v0 = vpop.permute.xlu0 %846 }
 0x16d   : > { %v843_v58 = vpop.permute.xlu1 %842  ;;  %v856_v2 = vsel %vm848_vm13, %v845_v55, %v847_v0  ;;  %876 = vst.msk [vmem:[#allocation2 + $0x408] sm:$0xff] %vm282_vm0, %v847_v0  ;;  %v2409_v0 = vld [vmem:[%s3125_s3 + $0xf0] sm:$0xff]  }
 0x16e   : > { %v855_v59 = vsel %vm848_vm13, %v843_v58, %v845_v55  ;;  %1294 = vmatprep.subr.bf16.mxu1 %v856_v2  ;;  %v2407_v55 = vld [vmem:[%s3125_s3 + $0xa8] sm:$0xff]   ;;  %v2411_v2 = vld [vmem:[%s3125_s3 + $0xb0] sm:$0xff]  }
 0x16f   : > { %1295 = vmatpush1.bf16.msra.mxu1 %v855_v59  ;;  %v2412_v59 = vld [vmem:[%s3125_s3 + $0x70] sm:$0xff]  }
 0x170   : > { %v841_v3 = vpop.permute.xlu0 %840  ;;  %1393 = vmatprep.subr.bf16.mxu1 %v2452_v57 }
 0x171   : > { %v839_v60 = vpop.permute.xlu1 %838  ;;  %v854_v61 = vsel %vm848_vm13, %v841_v3, %v843_v58  ;;  %v2410_v58 = vld [vmem:[%s3125_s3 + $0x28] sm:$0xff]  }
 0x172   : > { %v853_v62 = vsel %vm848_vm13, %v839_v60, %v841_v3  ;;  %1172 = vmatprep.subr.bf16.mxu0 %v854_v61  ;;  %1309 = vmatmul.mubr.bf16.vlgmr.msra.gmra.mrb[0].mxu1 %v2888_v1  ;;  %v2414_v3 = vld [vmem:[%s3125_s3 + $0x30] sm:$0xff]   ;;  %v2415_v60 = vld [vmem:[%s3125_s3 + $0xb8] sm:$0xff]  }
 0x173   : > { %1173 = vmatpush1.bf16.msra.mxu0 %v853_v62  ;;  %1394 = vmatpush1.bf16.msra.mxu1 %v961_v4  ;;  %v2416_v61 = vld [vmem:[%s3125_s3 + $0x78] sm:$0xff]   ;;  %v2453_v62 = vmov 0.0  }
 0x174   : > { %2153 = vmatprep.subr.bf16.mxu0 %v921_v7  ;;  %1395 = vmatprep.subr.bf16.mxu1 %v2452_v57  ;;  %v1006_v43 = vld [vmem:[#allocation2 + $0x408] sm:$0xff] }
 0x175   : > { %2108 = vmatprep.mubr.msk.bf16.mxu1 %vm1083_vm9, %v2895_v5 }
 0x176   : > { %1187 = vmatmul.mubr.bf16.vlgmr.msra.gmra.mrb[0].mxu0 %v2888_v1 }
 0x177   : > { %2154 = vmatpush3.bf16.msra.mxu0 %v881_v63  ;;  %1396 = vmatpush1.bf16.msra.mxu1 %v966_v10 }
 0x178   : > { %2155 = vmatprep.subr.bf16.mxu0 %v926_v12  ;;  %1397 = vmatprep.subr.bf16.mxu1 %v2452_v57 }
 0x179   : > { %2105 = vmatprep.mubr.msk.bf16.mxu0 %vm1083_vm9, %v2895_v5 }
 0x17a   : > { %1319 = vmatmul.mubr.bf16.gmra.mrb[4].mxu1 %v2906_v6 }
 0x17b   : > { %2156 = vmatpush3.bf16.msra.mxu0 %v886_v13  ;;  %1398 = vmatpush1.bf16.msra.mxu1 %v971_v15 }
 0x17c   : > { %2157 = vmatprep.subr.bf16.mxu0 %v931_v9  ;;  %1399 = vmatprep.subr.bf16.mxu1 %v2452_v57 }
 0x17d   : > { %2109 = vmatprep.mubr.msk.bf16.mxu1 %vm1083_vm9, %v2914_v14 }
 0x17e   : > { %1197 = vmatmul.mubr.bf16.gmra.mrb[4].mxu0 %v2906_v6 }
 0x17f   : > { %2158 = vmatpush3.bf16.msra.mxu0 %v891_v8  ;;  %1400 = vmatpush1.bf16.msra.mxu1 %v976_v18 }
 0x180   : > { %2159 = vmatprep.subr.bf16.mxu0 %v936_v20  ;;  %1401 = vmatprep.subr.bf16.mxu1 %v2452_v57 }
 0x181   : > { %2106 = vmatprep.mubr.msk.bf16.mxu0 %vm1083_vm9, %v2914_v14  ;;  %v3048_v4 = vpop.permute.xlu0 %1009 }
 0x182   : > { %1329 = vmatmul.mubr.bf16.gmra.mrb[8].mxu1 %v2921_v19  ;;  %v3050_v63 = vpop.permute.xlu1 %1014 }
 0x183   : > { %2160 = vmatpush3.bf16.msra.mxu0 %v896_v21  ;;  %1402 = vmatpush1.bf16.msra.mxu1 %v981_v22 }
 0x184   : > { %2161 = vmatprep.subr.bf16.mxu0 %v941_v23  ;;  %1403 = vmatprep.subr.bf16.mxu1 %v2452_v57 }
 0x185   : > { %2110 = vmatprep.mubr.msk.bf16.mxu1 %vm1083_vm9, %v2821_v39  ;;  %v951_v39 = vld [vmem:[#allocation2 + $0x250] sm:$0xff] }
 0x186   : > { %1207 = vmatmul.mubr.bf16.gmra.mrb[8].mxu0 %v2921_v19 }
 0x187   : > { %2162 = vmatpush3.bf16.msra.mxu0 %v901_v24  ;;  %1404 = vmatpush1.bf16.msra.mxu1 %v986_v25  ;;  %v3058_v25 = vpop.permute.xlu1 %1019 }
 0x188   : > { %2163 = vmatprep.subr.bf16.mxu0 %v946_v27  ;;  %1405 = vmatprep.subr.bf16.mxu1 %v2452_v57 }
 0x189   : > { %1369 = vmatprep.mubr.bf16.mxu0 %v2431_v29 }
 0x18b   : > { %2164 = vmatpush3.bf16.msra.mxu0 %v906_v30  ;;  %1406 = vmatpush1.bf16.msra.mxu1 %v991_v31 }
 0x18c   : > { %2165 = vmatprep.subr.bf16.mxu0 %v951_v39  ;;  %1407 = vmatprep.subr.bf16.mxu1 %v2452_v57 }
 0x18f   : > { %2166 = vmatpush3.bf16.msra.mxu0 %v911_v32  ;;  %1408 = vmatpush1.bf16.msra.mxu1 %v996_v33 }
 0x190   : > { %2167 = vmatprep.subr.bf16.mxu0 %v956_v34  ;;  %1409 = vmatprep.subr.bf16.mxu1 %v2452_v57  ;;  %v3062_v34 = vpop.permute.xlu0 %1024 }
 0x193   : > { %2168 = vmatpush3.bf16.msra.mxu0 %v916_v37  ;;  %1410 = vmatpush1.bf16.msra.mxu1 %v1001_v38 }
 0x194   : > { %1411 = vmatprep.subr.bf16.mxu1 %v2452_v57  ;;  %2187 = vmatprep.subr.bf16.mxu0 %v2388_v35  ;;  %v2387_v57 = vld [vmem:[%s3125_s3 + $0x80] sm:$0xff]  }
 0x196   : > { %1370 = vmatmul.mubr.bf16.vlgmr.msra.gmra.mrb[12].mxu0 %v2782_v16  ;;  %v2396_v16 = vld [vmem:[%s3125_s3 + $0x50] sm:$0xff]  }
 0x197   : > { %1412 = vmatpush1.bf16.msra.mxu1 %v1006_v43  ;;  %1377 = vmatprep.mubr.bf16.mxu0 %v2787_v17  ;;  %v2391_v17 = vld [vmem:[%s3125_s3 + $0x88] sm:$0xff]  }
 0x198   : > { %2221 = vmatprep.subr.bf16.mxu1 %v2386_v40  ;;  %2188 = vmatpush3.bf16.msra.mxu0 %v2390_v41 }
 0x199   : > { %2189 = vmatprep.subr.bf16.mxu0 %v2392_v42 }
 0x19a   : > { %1426 = vmatmul.mubr.bf16.vlgmr.msra.gmra.mrb[12].mxu1 %v2888_v1  ;;  %v2413_v1 = vld [vmem:[%s3125_s3 + $0xf8] sm:$0xff]  }
 0x19b   : > { %2111 = vmatprep.mubr.msk.bf16.mxu1 %vm1083_vm9, %v2895_v5  ;;  %2222 = vmatpush3.bf16.msra.mxu1 %v2387_v57  ;;  %v2417_v5 = vld [vmem:[%s3125_s3 + $0x38] sm:$0xff]   ;;  %v2418_v57 = vld [vmem:[%s3125_s3 + $0x100] sm:$0xff]  }
 0x19c   : > { %2223 = vmatprep.subr.bf16.mxu1 %v2389_v44  ;;  %2190 = vmatpush3.bf16.msra.mxu0 %v2394_v45 }
 0x19d   : > { %2191 = vmatprep.subr.bf16.mxu0 %v2396_v16 }
 0x19e   : > { %1378 = vmatmul.mubr.bf16.gmra.mrb[16].mxu0 %v2802_v26  ;;  %v2398_v26 = vld [vmem:[%s3125_s3 + $0x98] sm:$0xff]  }
 0x19f   : > { %1385 = vmatprep.mubr.bf16.mxu0 %v2805_v28  ;;  %2224 = vmatpush3.bf16.msra.mxu1 %v2391_v17  ;;  %v2399_v28 = vld [vmem:[%s3125_s3 + $0x10] sm:$0xff]  }
 0x1a0   : > { %2225 = vmatprep.subr.bf16.mxu1 %v2393_v46  ;;  %2192 = vmatpush3.bf16.msra.mxu0 %v2399_v28 }
 0x1a1   : > { %2193 = vmatprep.subr.bf16.mxu0 %v2400_v49 }
 0x1a2   : > { %1434 = vmatmul.mubr.bf16.gmra.mrb[16].mxu1 %v2906_v6 }
 0x1a3   : > { %2112 = vmatprep.mubr.msk.bf16.mxu1 %vm1083_vm9, %v2914_v14  ;;  %2226 = vmatpush3.bf16.msra.mxu1 %v2395_v47 }
 0x1a4   : > { %2227 = vmatprep.subr.bf16.mxu1 %v2397_v48  ;;  %2194 = vmatpush3.bf16.msra.mxu0 %v2402_v50 }
 0x1a5   : > { %2195 = vmatprep.subr.bf16.mxu0 %v2404_v52 }
 0x1a6   : > { %1386 = vmatmul.mubr.bf16.gmra.mrb[20].mxu0 %v2813_v36  ;;  %v2401_v36 = vld [vmem:[%s3125_s3 + $0xe0] sm:$0xff]  }
 0x1a7   : > { %2228 = vmatpush3.bf16.msra.mxu1 %v2398_v26 }
 0x1a8   : > { %2229 = vmatprep.subr.bf16.mxu1 %v2401_v36  ;;  %2196 = vmatpush3.bf16.msra.mxu0 %v2406_v54  ;;  %v2419_v54 = vld [vmem:[%s3125_s3 + $0x108] sm:$0xff]  }
 0x1a9   : > { %2197 = vmatprep.subr.bf16.mxu0 %v2408_v56 }
 0x1aa   : > { %1442 = vmatmul.mubr.bf16.gmra.mrb[20].mxu1 %v2921_v19 }
 0x1ab   : > { %2230 = vmatpush3.bf16.msra.mxu1 %v2403_v51 }
 0x1ac   : > { %2231 = vmatprep.subr.bf16.mxu1 %v2405_v53  ;;  %2198 = vmatpush3.bf16.msra.mxu0 %v2410_v58  ;;  %v3074_v53 = vpop.permute.xlu1 %1029 }
 0x1ad   : > { %2199 = vmatprep.subr.bf16.mxu0 %v2412_v59 }
 0x1af   : > { %2232 = vmatpush3.bf16.msra.mxu1 %v2407_v55 }
 0x1b0   : > { %2233 = vmatprep.subr.bf16.mxu1 %v2409_v0  ;;  %2200 = vmatpush3.bf16.msra.mxu0 %v2414_v3 }
 0x1b1   : > { %2201 = vmatprep.subr.bf16.mxu0 %v2416_v61 }
 0x1b3   : > { %2234 = vmatpush3.bf16.msra.mxu1 %v2411_v2  ;;  %v2420_v2 = vld [vmem:[%s3125_s3 + $0x110] ss:$0 sps:$4 sm:$0x11]  }
 0x1b4   : > { %2235 = vmatprep.subr.bf16.mxu1 %v2413_v1  ;;  %2202 = vmatpush3.bf16.msra.mxu0 %v2417_v5 }
 0x1b5   : > { %2261 = vmatprep.subr.bf16.mxu0 %v2453_v62 }
 0x1b7   : > { %2236 = vmatpush3.bf16.msra.mxu1 %v2415_v60 }
 0x1b8   : > { %2279 = vmatprep.subr.bf16.mxu1 %v2453_v62 }
 0x245   : > { %v1310_v7 = vpop.f32.mrb[0].mxu1 }
 0x246   : > { %v2295_v10 = vadd.f32 %v1310_v7, %v3048_v4  ;;  %v1312_v6 = vpop.f32.mrb[1].mxu1 }
 0x247   : > { %v2296_v11 = vadd.f32 %v1312_v6, %v3048_v4  ;;  %v1314_v12 = vpop.f32.mrb[2].mxu1 }
 0x248   : > { %v1451_v13 = vmul.f32 %v2295_v10, %v2295_v10  ;;  %v2297_v14 = vadd.f32 %v1314_v12, %v3050_v63  ;;  %v1316_v15 = vpop.f32.mrb[3].mxu1 }
 0x249   : > { %v1452_v9 = vmul.f32 %v2296_v11, %v2296_v11  ;;  %v2298_v8 = vadd.f32 %v1316_v15, %v3050_v63  ;;  %v1188_v18 = vpop.f32.mrb[0].mxu0  ;;  %v1829_v15 = vsel %vm1827_vm14, %v2420_v2, 0 }
 0x24a   : > { %v1456_v19 = vmul.f32 %v2297_v14, %v2297_v14  ;;  %v2285_v20 = vadd.f32 %v1188_v18, %v3048_v4  ;;  %v1190_v21 = vpop.f32.mrb[1].mxu0 }
 0x24b   : > { %v1457_v22 = vmul.f32 %v2298_v8, %v2298_v8  ;;  %v2286_v23 = vadd.f32 %v1190_v21, %v3048_v4  ;;  %v1192_v24 = vpop.f32.mrb[2].mxu0 }
 0x24c   : > { %v1449_v27 = vmul.f32 %v2285_v20, %v2285_v20  ;;  %v2287_v29 = vadd.f32 %v1192_v24, %v3050_v63  ;;  %v1194_v30 = vpop.f32.mrb[3].mxu0  ;;  %v1529_v31 = vpack.c.bf16 %v1456_v19, %v1451_v13 }
 0x24d   : > { %v1450_v39 = vmul.f32 %v2286_v23, %v2286_v23  ;;  %v2288_v32 = vadd.f32 %v1194_v30, %v3050_v63  ;;  %v1320_v33 = vpop.f32.mrb[4].mxu1  ;;  %v1530_v35 = vpack.c.bf16 %v1457_v22, %v1452_v9 }
 0x24e   : > { %v1454_v37 = vmul.f32 %v2287_v29, %v2287_v29  ;;  %v2299_v38 = vadd.f32 %v1320_v33, %v3058_v25  ;;  %v1322_v40 = vpop.f32.mrb[5].mxu1 }
 0x24f   : > { %v1455_v41 = vmul.f32 %v2288_v32, %v2288_v32  ;;  %v2300_v42 = vadd.f32 %v1322_v40, %v3058_v25  ;;  %v1324_v43 = vpop.f32.mrb[6].mxu1  ;;  %1919 = vmatprep.mubr.bf16.mxu1 %v1530_v35 }
 0x250   : > { %v1461_v44 = vmul.f32 %v2299_v38, %v2299_v38  ;;  %v2301_v45 = vadd.f32 %v1324_v43, %v3062_v34  ;;  %v1326_v16 = vpop.f32.mrb[7].mxu1  ;;  %1920 = vmatmul.mubr.bf16.vlgmr.msra.gmra.mrb[24].mxu1 %v1529_v31  ;;  %v1527_v17 = vpack.c.bf16 %v1454_v37, %v1449_v27 }
 0x251   : > { %v1462_v46 = vmul.f32 %v2300_v42, %v2300_v42  ;;  %v2302_v47 = vadd.f32 %v1326_v16, %v3062_v34  ;;  %v1198_v48 = vpop.f32.mrb[4].mxu0  ;;  %v1528_v26 = vpack.c.bf16 %v1455_v41, %v1450_v39  ;;  %2282 = vmatpush3.bf16.msra.mxu1 %v2418_v57 }
 0x252   : > { %v1466_v28 = vmul.f32 %v2301_v45, %v2301_v45  ;;  %v2289_v49 = vadd.f32 %v1198_v48, %v3058_v25  ;;  %v1200_v36 = vpop.f32.mrb[5].mxu0  ;;  %2280 = vmatprep.subr.bf16.mxu1 %v2453_v62 }
 0x253   : > { %v1467_v50 = vmul.f32 %v2302_v47, %v2302_v47  ;;  %v2290_v51 = vadd.f32 %v1200_v36, %v3058_v25  ;;  %v1202_v52 = vpop.f32.mrb[6].mxu0  ;;  %1863 = vmatprep.mubr.bf16.mxu0 %v1528_v26 }
 0x254   : > { %v1459_v55 = vmul.f32 %v2289_v49, %v2289_v49  ;;  %v2291_v56 = vadd.f32 %v1202_v52, %v3062_v34  ;;  %v1204_v0 = vpop.f32.mrb[7].mxu0  ;;  %1864 = vmatmul.mubr.bf16.vlgmr.msra.gmra.mrb[24].mxu0 %v1527_v17  ;;  %v1534_v58 = vpack.c.bf16 %v1466_v28, %v1461_v44 }
 0x255   : > { %v1460_v59 = vmul.f32 %v2290_v51, %v2290_v51  ;;  %v2292_v1 = vadd.f32 %v1204_v0, %v3062_v34  ;;  %v1330_v3 = vpop.f32.mrb[8].mxu1  ;;  %v1535_v60 = vpack.c.bf16 %v1467_v50, %v1462_v46  ;;  %2262 = vmatpush3.bf16.msra.mxu0 %v2418_v57  ;;  %2283 = vmatpush3.bf16.msra.mxu1 %v2419_v54 }
 0x256   : > { %v1464_v61 = vmul.f32 %v2291_v56, %v2291_v56  ;;  %v2303_v5 = vadd.f32 %v1330_v3, %v3074_v53  ;;  %v1332_v7 = vpop.f32.mrb[9].mxu1  ;;  %2263 = vmatprep.subr.bf16.mxu0 %v2453_v62  ;;  %2281 = vmatprep.subr.bf16.mxu1 %v2453_v62 }
 0x257   : > { %v1465_v10 = vmul.f32 %v2292_v1, %v2292_v1  ;;  %v2304_v6 = vadd.f32 %v1332_v7, %v3074_v53  ;;  %v1334_v11 = vpop.f32.mrb[10].mxu1  ;;  %1927 = vmatprep.mubr.bf16.mxu1 %v1535_v60 }
 0x258   : > { %v1471_v12 = vmul.f32 %v2303_v5, %v2303_v5  ;;  %v1335_v13 = vpop.f32.mrb[11].mxu1  ;;  %1928 = vmatmul.mubr.bf16.gmra.mrb[28].mxu1 %v1534_v58  ;;  %v1532_v14 = vpack.c.bf16 %v1464_v61, %v1459_v55 }
 0x259   : > { %v1472_v9 = vmul.f32 %v2304_v6, %v2304_v6  ;;  %v1208_v8 = vpop.f32.mrb[8].mxu0  ;;  %v1533_v18 = vpack.c.bf16 %v1465_v10, %v1460_v59  ;;  %2264 = vmatpush3.bf16.msra.mxu0 %v2419_v54  ;;  %2284 = vmatpush3.bf16.msra.mxu1 %v1829_v15 }
 0x25a   : > { %v2293_v19 = vadd.f32 %v1208_v8, %v3074_v53  ;;  %v1210_v20 = vpop.f32.mrb[9].mxu0  ;;  %2265 = vmatprep.subr.bf16.mxu0 %v2453_v62  ;;  %v1539_v30 = vpack.c.bf16 %v1471_v12, %v1471_v12 }
 0x25b   : > { %v2294_v21 = vadd.f32 %v1210_v20, %v3074_v53  ;;  %v1212_v22 = vpop.f32.mrb[10].mxu0  ;;  %1871 = vmatprep.mubr.bf16.mxu0 %v1533_v18  ;;  %v1540_v23 = vpack.c.bf16 %v1472_v9, %v1472_v9 }
 0x25c   : > { %v1469_v24 = vmul.f32 %v2293_v19, %v2293_v19  ;;  %v1213_v27 = vpop.f32.mrb[11].mxu0  ;;  %1872 = vmatmul.mubr.bf16.gmra.mrb[28].mxu0 %v1532_v14 }
 0x25d   : > { %v1470_v29 = vmul.f32 %v2294_v21, %v2294_v21  ;;  %1935 = vmatprep.mubr.bf16.mxu1 %v1540_v23  ;;  %2266 = vmatpush3.bf16.msra.mxu0 %v1829_v15 }
 0x25e   : > { %v1537_v39 = vpack.c.bf16 %v1469_v24, %v1469_v24 }
 0x25f   : > { %v1538_v31 = vpack.c.bf16 %v1470_v29, %v1470_v29 }
 0x260   : > { %1936 = vmatmul.mubr.bf16.gmra.mrb[32].mxu1 %v1539_v30 }
 0x261   : > { %1879 = vmatprep.mubr.bf16.mxu0 %v1538_v31  ;;  %2275 = vmatprep.mubr.msk.bf16.mxu1 %vm2454_vm15, %v2453_v62 }
 0x264   : > { %1880 = vmatmul.mubr.bf16.gmra.mrb[32].mxu0 %v1537_v39 }
 0x265   : > { %2267 = vmatprep.mubr.msk.bf16.mxu0 %vm2454_vm15, %v2453_v62 }
 0x269   : > { %v2169_v32 = vpop.f32.mrb[12].mxu0 }
 0x26a   : > { %v2170_v33 = vpop.f32.mrb[13].mxu0 }
 0x26b   : > { %v2171_v35 = vadd.f32 %v2170_v33, %v2169_v32  ;;  %v2172_v37 = vpop.f32.mrb[14].mxu0 }
 0x26c   : > { %v2173_v38 = vpop.f32.mrb[15].mxu0 }
 0x26d   : > { %v2174_v40 = vadd.f32 %v2173_v38, %v2172_v37  ;;  %v1372_v41 = vadd.f32 %v2171_v35, %v3048_v4  ;;  %v1427_v42 = vpop.f32.mrb[12].mxu1 }
 0x26e   : > { %v1429_v43 = vpop.f32.mrb[13].mxu1 }
 0x26f   : > { %v1428_v57 = vadd.f32 %v1427_v42, %v1372_v41  ;;  %v1375_v44 = vadd.f32 %v2174_v40, %v3050_v63  ;;  %v1430_v45 = vpop.f32.mrb[14].mxu1 }
 0x270   : > { %v1432_v16 = vpop.f32.mrb[15].mxu1 }
 0x271   : > { %v1453_v17 = vmul.f32 %v1428_v57, %v1428_v57  ;;  %v1431_v46 = vadd.f32 %v1430_v45, %v1375_v44  ;;  %v2175_v47 = vpop.f32.mrb[16].mxu0 }
 0x272   : > { %v2176_v48 = vpop.f32.mrb[17].mxu0 }
 0x273   : > { %1481 = vst.msk [vmem:[#allocation3 + $0x20] sm:$0xff] %vm282_vm0, %v1453_v17  ;;  %v1458_v26 = vmul.f32 %v1431_v46, %v1431_v46  ;;  %v2177_v28 = vadd.f32 %v2176_v48, %v2175_v47  ;;  %v2178_v49 = vpop.f32.mrb[18].mxu0 }
 0x274   : > { %v2179_v36 = vpop.f32.mrb[19].mxu0 }
 0x275   : > { %1486 = vst.msk [vmem:[#allocation3 + $0x48] sm:$0xff] %vm282_vm0, %v1458_v26  ;;  %v2180_v4 = vadd.f32 %v2179_v36, %v2178_v49  ;;  %v1380_v50 = vadd.f32 %v2177_v28, %v3058_v25  ;;  %v1435_v51 = vpop.f32.mrb[16].mxu1 }
 0x276   : > { %v1437_v52 = vpop.f32.mrb[17].mxu1 }
 0x277   : > { %v1436_v63 = vadd.f32 %v1435_v51, %v1380_v50  ;;  %v1383_v54 = vadd.f32 %v2180_v4, %v3062_v34  ;;  %v1438_v55 = vpop.f32.mrb[18].mxu1 }
 0x278   : > { %v1440_v56 = vpop.f32.mrb[19].mxu1 }
 0x279   : > { %v1463_v0 = vmul.f32 %v1436_v63, %v1436_v63  ;;  %v1439_v58 = vadd.f32 %v1438_v55, %v1383_v54  ;;  %v2181_v2 = vpop.f32.mrb[20].mxu0 }
 0x27a   : > { %v2182_v59 = vpop.f32.mrb[21].mxu0  ;;  %v1506_v5 = vld [vmem:[#allocation3 + $0x20] sm:$0xff] }
 0x27b   : > { %1491 = vst.msk [vmem:[#allocation3 + $0x70] sm:$0xff] %vm282_vm0, %v1463_v0  ;;  %v1468_v1 = vmul.f32 %v1439_v58, %v1439_v58  ;;  %v2183_v3 = vadd.f32 %v2182_v59, %v2181_v2  ;;  %v2184_v60 = vpop.f32.mrb[22].mxu0 }
 0x27c   : > { %v2185_v61 = vpop.f32.mrb[23].mxu0  ;;  %v1511_v7 = vld [vmem:[#allocation3 + $0x48] sm:$0xff] }
 0x27d   : > { %1496 = vst.msk [vmem:[#allocation3 + $0x98] sm:$0xff] %vm282_vm0, %v1468_v1  ;;  %v1388_v25 = vadd.f32 %v2183_v3, %v3074_v53  ;;  %v1443_v10 = vpop.f32.mrb[20].mxu1  ;;  %v1531_v34 = vpack.c.bf16 %v1511_v7, %v1506_v5 }
 0x27e   : > { %v1445_v6 = vpop.f32.mrb[21].mxu1 }
 0x27f   : > { %v1444_v11 = vadd.f32 %v1443_v10, %v1388_v25  ;;  %v1446_v12 = vpop.f32.mrb[22].mxu1  ;;  %2268 = vmatmul.mubr.msk.bf16.vlgmr.msra.gmra.mrb[36].mxu0 %vm282_vm0, %v1531_v34 }
 0x280   : > { %v1447_v13 = vpop.f32.mrb[23].mxu1  ;;  %2271 = vmatprep.mubr.msk.bf16.mxu0 %vm2454_vm15, %v2453_v62 }
 0x281   : > { %v1473_v14 = vmul.f32 %v1444_v11, %v1444_v11 }
 0x282   : > { %v1516_v15 = vld [vmem:[#allocation3 + $0x70] sm:$0xff] }
 0x283   : > { %1501 = vst.msk [vmem:[#allocation3 + $0xc0] sm:$0xff] %vm282_vm0, %v1473_v14 }
 0x284   : > { %v1521_v9 = vld [vmem:[#allocation3 + $0x98] sm:$0xff] }
 0x285   : > { %v1536_v8 = vpack.c.bf16 %v1521_v9, %v1516_v15 }
 0x287   : > { %2272 = vmatmul.mubr.msk.bf16.gmra.mrb[40].mxu0 %vm282_vm0, %v1536_v8 }
 0x28a   : > { %v1526_v53 = vld [vmem:[#allocation3 + $0xc0] sm:$0xff] }
 0x28b   : > { %v1541_v18 = vpack.c.bf16 %v1526_v53, %v1526_v53 }
 0x28d   : > { %2276 = vmatmul.mubr.msk.bf16.vlgmr.msra.gmra.mrb[36].mxu1 %vm282_vm0, %v1541_v18  ;;  %vm2014_vm0 = vcmask 605184  }
 0x323   : > { %v2237_v19 = vpop.f32.mrb[24].mxu1 }
 0x324   : > { %v2238_v20 = vpop.f32.mrb[25].mxu1 }
 0x325   : > { %v2239_v21 = vadd.f32 %v2238_v20, %v2237_v19  ;;  %v2240_v22 = vpop.f32.mrb[26].mxu1 }
 0x326   : > { %v2241_v23 = vpop.f32.mrb[27].mxu1 }
 0x327   : > { %v2242_v24 = vadd.f32 %v2241_v23, %v2240_v22  ;;  %v2203_v27 = vpop.f32.mrb[24].mxu0 }
 0x328   : > { %v2204_v62 = vpop.f32.mrb[25].mxu0 }
 0x329   : > { %v2205_v29 = vadd.f32 %v2204_v62, %v2203_v27  ;;  %v2206_v30 = vpop.f32.mrb[26].mxu0 }
 0x32a   : > { %v2207_v31 = vpop.f32.mrb[27].mxu0 }
 0x32b   : > { %v2208_v39 = vadd.f32 %v2207_v31, %v2206_v30  ;;  %v2243_v32 = vpop.f32.mrb[28].mxu1  ;;  %v1922_v33 = vadd.f32 %v2239_v21, %v2205_v29 }
 0x32c   : > { %v2244_v35 = vpop.f32.mrb[29].mxu1 }
 0x32d   : > { %v2245_v37 = vadd.f32 %v2244_v35, %v2243_v32  ;;  %v2246_v38 = vpop.f32.mrb[30].mxu1  ;;  %v1925_v40 = vadd.f32 %v2242_v24, %v2208_v39 }
 0x32e   : > { %v2247_v41 = vpop.f32.mrb[31].mxu1 }
 0x32f   : > { %v2248_v42 = vadd.f32 %v2247_v41, %v2246_v38  ;;  %v2209_v43 = vpop.f32.mrb[28].mxu0 }
 0x330   : > { %v2210_v57 = vpop.f32.mrb[29].mxu0 }
 0x331   : > { %v2211_v44 = vadd.f32 %v2210_v57, %v2209_v43  ;;  %v2212_v45 = vpop.f32.mrb[30].mxu0 }
 0x332   : > { %v2213_v16 = vpop.f32.mrb[31].mxu0 }
 0x333   : > { %v2214_v17 = vadd.f32 %v2213_v16, %v2212_v45  ;;  %v2249_v46 = vpop.f32.mrb[32].mxu1  ;;  %v1930_v47 = vadd.f32 %v2245_v37, %v2211_v44 }
 0x334   : > { %v2250_v48 = vpop.f32.mrb[33].mxu1 }
 0x335   : > { %v2251_v26 = vadd.f32 %v2250_v48, %v2249_v46  ;;  %v2252_v28 = vpop.f32.mrb[34].mxu1  ;;  %v1933_v49 = vadd.f32 %v2248_v42, %v2214_v17 }
 0x336   : > { %v2253_v36 = vpop.f32.mrb[35].mxu1 }
 0x337   : > { %v2215_v4 = vpop.f32.mrb[32].mxu0 }
 0x338   : > { %v2216_v50 = vpop.f32.mrb[33].mxu0 }
 0x339   : > { %v2217_v51 = vadd.f32 %v2216_v50, %v2215_v4  ;;  %v2218_v52 = vpop.f32.mrb[34].mxu0 }
 0x33a   : > { %v2219_v63 = vpop.f32.mrb[35].mxu0 }
 0x33b   : > { %v1938_v54 = vadd.f32 %v2251_v26, %v2217_v51 }
 0x352   : > { %v1977_v55 = vpop.f32.mrb[36].mxu0 }
 0x353   : > { %v1978_v56 = vadd.f32 %v1977_v55, %v1922_v33  ;;  %v2269_v0 = vpop.f32.mrb[37].mxu0 }
 0x354   : > { %v1980_v58 = vpop.f32.mrb[38].mxu0 }
 0x355   : > { %v1999_v2 = vmul.f32 0.028571429, %v1978_v56  ;;  %v1981_v59 = vadd.f32 %v1980_v58, %v1925_v40  ;;  %v2270_v1 = vpop.f32.mrb[39].mxu0 }
 0x357   : > { %2421 = vlog2.f32 %v1999_v2  ;;  %v2000_v3 = vmul.f32 0.028571429, %v1981_v59 }
 0x359   : > { %2423 = vlog2.f32 %v2000_v3 }
 0x35a   : > { %v1985_v60 = vpop.f32.mrb[40].mxu0 }
 0x35b   : > { %v1986_v61 = vadd.f32 %v1985_v60, %v1930_v47  ;;  %v2273_v5 = vpop.f32.mrb[41].mxu0 }
 0x35c   : > { %v1988_v7 = vpop.f32.mrb[42].mxu0 }
 0x35d   : > { %v2001_v25 = vmul.f32 0.028571429, %v1986_v61  ;;  %v1989_v10 = vadd.f32 %v1988_v7, %v1933_v49  ;;  %v2274_v34 = vpop.f32.mrb[43].mxu0 }
 0x35f   : > { %2425 = vlog2.f32 %v2001_v25  ;;  %v2002_v6 = vmul.f32 0.028571429, %v1989_v10 }
 0x360   : > { %v1993_v11 = vpop.f32.mrb[36].mxu1 }
 0x361   : > { %v2422_v12 = vpop.eup %2421  ;;  %2427 = vlog2.f32 %v2002_v6  ;;  %v1994_v13 = vadd.f32 %v1993_v11, %v1938_v54  ;;  %v2277_v14 = vpop.f32.mrb[37].mxu1 }
 0x362   : > { %v2005_v15 = vmul.f32 0.6931472, %v2422_v12  ;;  %v1996_v9 = vpop.f32.mrb[38].mxu1 }
 0x363   : > { %v2424_v8 = vpop.eup %2423  ;;  %v2003_v53 = vmul.f32 0.028571429, %v1994_v13  ;;  %v2278_v18 = vpop.f32.mrb[39].mxu1 }
 0x364   : > { %2015 = vst.msk [vmem:[%s197_s18] sm:$0xff] %vm2014_vm0, %v2005_v15  ;;  %v2007_v19 = vmul.f32 0.6931472, %v2424_v8 }
 0x365   : > { %2429 = vlog2.f32 %v2003_v53 }
 0x366   : > { %2016 = vst.msk [vmem:[%s197_s18 + $0x8] sm:$0xff] %vm2014_vm0, %v2007_v19 }
 0x369   : > { %v2426_v20 = vpop.eup %2425 }
 0x36a   : > { %v2009_v21 = vmul.f32 0.6931472, %v2426_v20 }
 0x36b   : > { %v2428_v22 = vpop.eup %2427 }
 0x36c   : > { %2017 = vst.msk [vmem:[%s197_s18 + $0x10] sm:$0xff] %vm2014_vm0, %v2009_v21  ;;  %v2011_v23 = vmul.f32 0.6931472, %v2428_v22 }
 0x36e   : > { %2018 = vst.msk [vmem:[%s197_s18 + $0x18] sm:$0xff] %vm2014_vm0, %v2011_v23 }
 0x36f   : > { %v2430_v24 = vpop.eup %2429 }
 0x370   : > { %v2013_v27 = vmul.f32 0.6931472, %v2430_v24 }
 0x372   : > { %2019 = vst.msk [vmem:[%s197_s18 + $0x20] sm:$0xff] %vm2014_vm0, %v2013_v27 }
 0x373 PF: > { %s14_s15 = sadd.s32 1, %s2438_s15  }
 0x374   : > { %p11_p4 = scmp.ge.s32.totalorder %s14_s15, 4  }
 0x376   :  { %13 = sbr.rel (!%p11_p4) target bundleno = 1 (0x1), region = 67 }

</bundles_post_ra>
